<compile_context>
chip_gen: v5e
topology: v5e:2x2
jax: 0.10.0
libtpu: 0.0.40
codegen_flags: <defaults>
</compile_context>

<pallas_src>
import functools

import jax
import jax.numpy as jnp
from jax.experimental import pallas as pl
from jax.experimental.pallas import tpu as pltpu


def _phase_weights(w_hwio):
    """Collapse the 3x3 kernel into 4 phase-specific 2x2 kernels.

    For nearest-2x upsampling, output pixel (2*iy+py, 2*ix+px) depends only on a 2x2
    neighbourhood of the ORIGINAL image.  Along one axis the 3 taps collapse as:
      phase 0 -> offsets (-1, 0) with weights (w0, w1+w2)
      phase 1 -> offsets ( 0,+1) with weights (w0+w1, w2)
    Returns (4, 4, Cin, Cout) indexed by [2*py+px, 2*a+c, Cin, Cout].
    """
    tap_sets = {(0, 0): (0,), (0, 1): (1, 2), (1, 0): (0, 1), (1, 1): (2,)}
    phases = []
    for py in range(2):
        for px in range(2):
            taps = []
            for a in range(2):
                for c in range(2):
                    acc = None
                    for ky in tap_sets[(py, a)]:
                        for kx in tap_sets[(px, c)]:
                            term = w_hwio[ky, kx]
                            acc = term if acc is None else acc + term
                    taps.append(acc)
            phases.append(jnp.stack(taps, axis=0))
    return jnp.stack(phases, axis=0)


def _upsample_rmsnorm_conv_kernel(x_ref, halo_ref, w_ref, b_ref, o_ref, xn_ref, *, eps):
    """One (batch, row-tile) grid step.

    x_ref:    (1, TH, W, C)        raw input rows of this tile (f32, NHWC)
    halo_ref: (1, 1, 2, W, C)      row above / below the tile (zeros at image border)
    w_ref:    (4, 2, 2C, C)        per-phase, per-row-tap K-fused weights (bf16)
    b_ref:    (1, C)               conv bias (f32)
    o_ref:    (1, 2, 2, TH, W, C)  phase-major output tile (o[0,py,px,y,x] = out(2y+py,2x+px))
    xn_ref:   (TH+2, W+2, C)       bf16 scratch: normalized rows + zero conv padding
    """
    _, TH, W, C = x_ref.shape
    R = (TH + 2) * W

    def rmsnorm(v):
        v = v.astype(jnp.float32)
        var = jnp.mean(v * v, axis=-1, keepdims=True)
        return (v * jax.lax.rsqrt(var + eps)).astype(jnp.bfloat16)

    # --- normalized + zero-padded tile written once into VMEM scratch. -------------
    zcol = jnp.zeros((TH + 2, 1, C), jnp.bfloat16)
    xn_ref[:, 0:1, :] = zcol                          # left conv padding column
    xn_ref[:, W + 1:W + 2, :] = zcol                  # right conv padding column
    halo = halo_ref[0, 0]                             # (2, W, C); zeros at image border
    xn_ref[0:1, 1:W + 1, :] = rmsnorm(halo[0:1])
    xn_ref[TH + 1:TH + 2, 1:W + 1, :] = rmsnorm(halo[1:2])
    xn_ref[1:TH + 1, 1:W + 1, :] = rmsnorm(x_ref[0])

    # --- only 3 column-shifted slabs; horizontal tap pairs lane-concatenated so each
    #     phase does 2 MXU matmuls with K = 2C (fills the 256-wide MXU on v6e/v7x). ---
    s0 = xn_ref[:, 0:W, :].reshape(R, C)
    s1 = xn_ref[:, 1:W + 1, :].reshape(R, C)
    s2 = xn_ref[:, 2:W + 2, :].reshape(R, C)
    pair = (jnp.concatenate([s0, s1], axis=-1),       # consumed by phases with px == 0
            jnp.concatenate([s1, s2], axis=-1))       # consumed by phases with px == 1

    bias = jnp.broadcast_to(b_ref[0].astype(jnp.float32), (TH * W, C))  # hoisted once

    # --- one phase at a time: single live f32 accumulator (bias-initialized), stored
    #     immediately as a lane-dense phase-major slab (no in-kernel interleave). -----
    for py in range(2):
        for px in range(2):
            p = 2 * py + px
            acc = bias
            for a in range(2):                        # vertical taps (row offsets)
                off = (py + a) * W
                acc = acc + jnp.dot(pair[px][off:off + TH * W, :], w_ref[p, a],
                                    preferred_element_type=jnp.float32)
            o_ref[0, py, px] = acc.reshape(TH, W, C).astype(o_ref.dtype)


def upsample2d_forward(x, conv_w, conv_b, gamma, *, eps=1e-5, scale=2,
                       block_h=None, out_dtype=jnp.bfloat16):
    """x: (N, C, H, W) float32 (PyTorch NCHW).  Returns (N, C, 2H, 2W) in out_dtype."""
    if scale != 2:
        raise NotImplementedError("kernel is specialized for scale_factor=2")
    N, C, H, W = x.shape

    # --- generation-aware VMEM budget (v7x: 64 MiB, v5e/v6e: 128 MiB), with headroom. ---
    try:
        vmem_cap = int(pltpu.get_tpu_info().vmem_capacity_bytes)
    except Exception:
        vmem_cap = 64 * 1024 * 1024                   # conservative fallback (v7x size)
    vmem_limit = max(32 << 20, min(vmem_cap - (16 << 20), int(vmem_cap * 0.8)))

    out_itemsize = jnp.dtype(out_dtype).itemsize
    auto = block_h is None
    if auto:
        # rough VMEM bytes per original row of a tile (double-buffered I/O + scratch)
        per_row = W * C * (2 * 4                      # f32 input tile, double-buffered
                           + 2 * 4 * out_itemsize     # 4-phase output tile, double-buffered
                           + 2                        # bf16 normalized scratch
                           + 2 * 2 * 2                # two lane-fused (2C) bf16 slabs
                           + 2 * 4)                   # f32 accumulator + temporaries
        block_h = max(1, (vmem_limit // 2) // per_row)
    th = max(1, min(block_h, H))
    T = -(-H // th)
    if auto and N * T < 2 and H >= 2:                 # v7x megacore: give both TCs work
        th = -(-H // 2)
        T = -(-H // th)
    Hp = T * th

    # --- layout: NCHW -> NHWC (channels on the lane dim); 1x-resolution pass. ---------
    x_nhwc = jnp.transpose(x, (0, 2, 3, 1))           # (N, H, W, C)
    if Hp != H:
        # ragged last tile: pad rows with zeros (zeros == conv padding under RMSNorm;
        # the extra output rows are sliced off below).
        x_nhwc = jnp.pad(x_nhwc, ((0, 0), (0, Hp - H), (0, 0), (0, 0)))

    # --- per-tile halo rows sliced directly (no full-image pad copy). ------------------
    zero_row = jnp.zeros((N, 1, W, C), x_nhwc.dtype)
    if T > 1:
        tops = jnp.concatenate([zero_row, x_nhwc[:, th - 1:Hp - 1:th]], axis=1)
        bots = jnp.concatenate([x_nhwc[:, th:Hp:th], zero_row], axis=1)
    else:
        tops, bots = zero_row, zero_row
    halo = jnp.stack([tops, bots], axis=2)            # (N, T, 2, W, C)

    # --- fold RMSNorm gamma into the conv weight; build K-fused 4-phase tap weights. ---
    w_hwio = jnp.transpose(conv_w, (2, 3, 1, 0)) * gamma.reshape(1, 1, C, 1)
    wp = _phase_weights(w_hwio)                       # (4, 4, Cin, Cout), dim1 = 2*a + c
    wf = wp.reshape(4, 2, 2 * C, C).astype(jnp.bfloat16)   # [p, a, c*Cin, Cout]
    b2 = conv_b.reshape(1, C).astype(jnp.float32)

    kernel = functools.partial(_upsample_rmsnorm_conv_kernel, eps=eps)
    out_pm = pl.pallas_call(
        kernel,
        out_shape=jax.ShapeDtypeStruct((N, 2, 2, Hp, W, C), out_dtype),
        grid=(N, T),
        in_specs=[
            pl.BlockSpec((1, th, W, C), lambda n, t: (n, t, 0, 0)),
            pl.BlockSpec((1, 1, 2, W, C), lambda n, t: (n, t, 0, 0, 0)),
            pl.BlockSpec((4, 2, 2 * C, C), lambda n, t: (0, 0, 0, 0)),
            pl.BlockSpec((1, C), lambda n, t: (0, 0)),
        ],
        out_specs=pl.BlockSpec((1, 2, 2, th, W, C), lambda n, t: (n, 0, 0, t, 0, 0)),
        scratch_shapes=[pltpu.VMEM((th + 2, W + 2, C), jnp.bfloat16)],
        compiler_params=pltpu.CompilerParams(
            dimension_semantics=("parallel", "parallel"),
            vmem_limit_bytes=int(vmem_limit)),
    )(x_nhwc, halo, wf, b2)

    # --- single wrapper transpose: 2x2 phase interleave + NHWC -> NCHW in one pass. ----
    out = jnp.transpose(out_pm, (0, 5, 3, 1, 4, 2)).reshape(N, C, 2 * Hp, 2 * W)
    if Hp != H:
        out = out[:, :, :2 * H, :]
    return out


def _reference(x, conv_w, conv_b, gamma, eps=1e-5, scale=2):
    """Pure-JAX (f32) mirror of the PyTorch forward (RMSNorm -> nearest up -> conv)."""
    xn = jnp.transpose(x, (0, 2, 3, 1))
    var = jnp.mean(xn * xn, axis=-1, keepdims=True)
    xn = xn * jax.lax.rsqrt(var + eps) * gamma
    xn = jnp.transpose(xn, (0, 3, 1, 2))
    up = jnp.repeat(jnp.repeat(xn, scale, axis=2), scale, axis=3)
    out = jax.lax.conv_general_dilated(
        up, conv_w, window_strides=(1, 1), padding=((1, 1), (1, 1)),
        dimension_numbers=('NCHW', 'OIHW', 'NCHW'))
    return out + conv_b.reshape(1, -1, 1, 1)


if __name__ == "__main__":
    # Small but representative: C=128 keeps the lane dim full; non-square H/W catches
    # axis-swap bugs; block_h=8 exercises the row-tiled (grid=(N, 2)) halo path.
    N, C, H, W = 2, 128, 16, 8
    key = jax.random.PRNGKey(0)
    kx, kw, kb, kg = jax.random.split(key, 4)

    x = jax.random.normal(kx, (N, C, H, W), dtype=jnp.float32)

    # Synthetic parameters (shapes from Conv2d(C, C, 3) / RMSNorm(C)); gamma perturbed
    # away from ones so the gamma-folding path is actually exercised.
    fan_in = C * 3 * 3
    bound = 1.0 / float(fan_in) ** 0.5
    conv_w = jax.random.uniform(kw, (C, C, 3, 3), jnp.float32, -bound, bound)
    conv_b = jax.random.uniform(kb, (C,), jnp.float32, -bound, bound)
    gamma = 1.0 + 0.1 * jax.random.normal(kg, (C,), dtype=jnp.float32)

    fwd = jax.jit(lambda *a: upsample2d_forward(*a, block_h=8))
    out = fwd(x, conv_w, conv_b, gamma)
    out = jax.block_until_ready(out)

    ref = _reference(x, conv_w, conv_b, gamma)
    assert out.shape == (N, C, 2 * H, 2 * W), out.shape
    # bf16 MXU matmuls + bf16 output vs. the f32 reference -> loosened tolerance.
    assert jnp.allclose(out.astype(jnp.float32), ref, atol=4e-2, rtol=4e-2), float(
        jnp.max(jnp.abs(out.astype(jnp.float32) - ref)))

    print("KERNEL_OK")
</pallas_src>

<mosaic_0001>
module attributes {stable_mosaic.version = 11 : i64} {
  func.func @_upsample_rmsnorm_conv_kernel(%arg0: i32, %arg1: i32, %arg2: memref<1x8x8x128xf32, #tpu.memory_space<vmem>>, %arg3: memref<1x1x2x8x128xf32, #tpu.memory_space<vmem>>, %arg4: memref<4x2x256x128xbf16, #tpu.memory_space<vmem>>, %arg5: memref<1x128xf32, #tpu.memory_space<vmem>>, %arg6: memref<1x2x2x8x8x128xbf16, #tpu.memory_space<vmem>>, %arg7: memref<10x10x128xbf16, #tpu.memory_space<vmem>>) attributes {dimension_semantics = [#tpu.dimension_semantics<parallel>, #tpu.dimension_semantics<parallel>], iteration_bounds = array<i64: 2, 2>, scalar_prefetch = 0 : i64, scratch_operands = 1 : i64, tpu.core_type = #tpu.core_type<tc>, window_params = [{transform_indices = @transform_0, window_bounds = array<i64: 1, 8, 8, 128>}, {transform_indices = @transform_1, window_bounds = array<i64: 1, 1, 2, 8, 128>}, {pipeline_mode = #tpu.pipeline_mode<synchronous>, transform_indices = @transform_2, window_bounds = array<i64: 4, 2, 256, 128>}, {pipeline_mode = #tpu.pipeline_mode<synchronous>, transform_indices = @transform_3, window_bounds = array<i64: 1, 128>}, {transform_indices = @transform_4, window_bounds = array<i64: 1, 2, 2, 8, 8, 128>}]} {
    %cst = arith.constant 0.000000e+00 : bf16
    %0 = vector.broadcast %cst : bf16 to vector<10x1x128xbf16>
    %c0 = arith.constant 0 : index
    %c0_0 = arith.constant 0 : index
    %c0_1 = arith.constant 0 : index
    %1 = vector.load %arg7[%c0, %c0_0, %c0_1] : memref<10x10x128xbf16, #tpu.memory_space<vmem>>, vector<10x1x128xbf16>
    tpu.vector_store %arg7[%c0, %c0_0, %c0_1], %0 {strides = array<i32>} : memref<10x10x128xbf16, #tpu.memory_space<vmem>>, vector<10x1x128xbf16>,
    %c0_2 = arith.constant 0 : index
    %c9 = arith.constant 9 : index
    %c0_3 = arith.constant 0 : index
    %2 = vector.load %arg7[%c0_2, %c9, %c0_3] : memref<10x10x128xbf16, #tpu.memory_space<vmem>>, vector<10x1x128xbf16>
    tpu.vector_store %arg7[%c0_2, %c9, %c0_3], %0 {strides = array<i32>} : memref<10x10x128xbf16, #tpu.memory_space<vmem>>, vector<10x1x128xbf16>,
    %c0_4 = arith.constant 0 : index
    %c0_5 = arith.constant 0 : index
    %c0_6 = arith.constant 0 : index
    %c0_7 = arith.constant 0 : index
    %c0_8 = arith.constant 0 : index
    %3 = vector.load %arg3[%c0_4, %c0_5, %c0_6, %c0_7, %c0_8] : memref<1x1x2x8x128xf32, #tpu.memory_space<vmem>>, vector<1x1x2x8x128xf32>
    %4 = vector.shape_cast %3 : vector<1x1x2x8x128xf32> to vector<2x8x128xf32>
    %5 = vector.extract_strided_slice %4 {offsets = [0, 0, 0], sizes = [1, 8, 128], strides = [1, 1, 1]} : vector<2x8x128xf32> to vector<1x8x128xf32>
    %6 = arith.mulf %5, %5 : vector<1x8x128xf32>
    %cst_9 = arith.constant dense<0.000000e+00> : vector<1x8xf32>
    %7 = vector.multi_reduction <add>, %6, %cst_9 [2] : vector<1x8x128xf32> to vector<1x8xf32>
    %8 = vector.shape_cast %7 : vector<1x8xf32> to vector<1x8x1xf32>
    %cst_10 = arith.constant 1.280000e+02 : f32
    %9 = vector.broadcast %cst_10 : f32 to vector<1x8x1xf32>
    %10 = arith.divf %8, %9 : vector<1x8x1xf32>
    %cst_11 = arith.constant 9.99999974E-6 : f32
    %11 = vector.broadcast %cst_11 : f32 to vector<1x8x1xf32>
    %12 = arith.addf %10, %11 : vector<1x8x1xf32>
    %13 = math.rsqrt %12 : vector<1x8x1xf32>
    %14 = vector.broadcast %13 : vector<1x8x1xf32> to vector<1x8x128xf32>
    %15 = arith.mulf %5, %14 : vector<1x8x128xf32>
    %16 = arith.truncf %15 : vector<1x8x128xf32> to vector<1x8x128xbf16>
    %c0_12 = arith.constant 0 : index
    %c1 = arith.constant 1 : index
    %c0_13 = arith.constant 0 : index
    %17 = vector.load %arg7[%c0_12, %c1, %c0_13] : memref<10x10x128xbf16, #tpu.memory_space<vmem>>, vector<1x8x128xbf16>
    tpu.vector_store %arg7[%c0_12, %c1, %c0_13], %16 {strides = array<i32>} : memref<10x10x128xbf16, #tpu.memory_space<vmem>>, vector<1x8x128xbf16>,
    %18 = vector.extract_strided_slice %4 {offsets = [1, 0, 0], sizes = [1, 8, 128], strides = [1, 1, 1]} : vector<2x8x128xf32> to vector<1x8x128xf32>
    %19 = arith.mulf %18, %18 : vector<1x8x128xf32>
    %cst_14 = arith.constant dense<0.000000e+00> : vector<1x8xf32>
    %20 = vector.multi_reduction <add>, %19, %cst_14 [2] : vector<1x8x128xf32> to vector<1x8xf32>
    %21 = vector.shape_cast %20 : vector<1x8xf32> to vector<1x8x1xf32>
    %cst_15 = arith.constant 1.280000e+02 : f32
    %22 = vector.broadcast %cst_15 : f32 to vector<1x8x1xf32>
    %23 = arith.divf %21, %22 : vector<1x8x1xf32>
    %cst_16 = arith.constant 9.99999974E-6 : f32
    %24 = vector.broadcast %cst_16 : f32 to vector<1x8x1xf32>
    %25 = arith.addf %23, %24 : vector<1x8x1xf32>
    %26 = math.rsqrt %25 : vector<1x8x1xf32>
    %27 = vector.broadcast %26 : vector<1x8x1xf32> to vector<1x8x128xf32>
    %28 = arith.mulf %18, %27 : vector<1x8x128xf32>
    %29 = arith.truncf %28 : vector<1x8x128xf32> to vector<1x8x128xbf16>
    %c9_17 = arith.constant 9 : index
    %c1_18 = arith.constant 1 : index
    %c0_19 = arith.constant 0 : index
    %30 = vector.load %arg7[%c9_17, %c1_18, %c0_19] : memref<10x10x128xbf16, #tpu.memory_space<vmem>>, vector<1x8x128xbf16>
    tpu.vector_store %arg7[%c9_17, %c1_18, %c0_19], %29 {strides = array<i32>} : memref<10x10x128xbf16, #tpu.memory_space<vmem>>, vector<1x8x128xbf16>,
    %c0_20 = arith.constant 0 : index
    %c0_21 = arith.constant 0 : index
    %c0_22 = arith.constant 0 : index
    %c0_23 = arith.constant 0 : index
    %31 = vector.load %arg2[%c0_20, %c0_21, %c0_22, %c0_23] : memref<1x8x8x128xf32, #tpu.memory_space<vmem>>, vector<1x8x8x128xf32>
    %32 = vector.shape_cast %31 : vector<1x8x8x128xf32> to vector<8x8x128xf32>
    %33 = arith.mulf %32, %32 : vector<8x8x128xf32>
    %cst_24 = arith.constant dense<0.000000e+00> : vector<8x8xf32>
    %34 = vector.multi_reduction <add>, %33, %cst_24 [2] : vector<8x8x128xf32> to vector<8x8xf32>
    %35 = vector.shape_cast %34 : vector<8x8xf32> to vector<8x8x1xf32>
    %cst_25 = arith.constant 1.280000e+02 : f32
    %36 = vector.broadcast %cst_25 : f32 to vector<8x8x1xf32>
    %37 = arith.divf %35, %36 : vector<8x8x1xf32>
    %cst_26 = arith.constant 9.99999974E-6 : f32
    %38 = vector.broadcast %cst_26 : f32 to vector<8x8x1xf32>
    %39 = arith.addf %37, %38 : vector<8x8x1xf32>
    %40 = math.rsqrt %39 : vector<8x8x1xf32>
    %41 = vector.broadcast %40 : vector<8x8x1xf32> to vector<8x8x128xf32>
    %42 = arith.mulf %32, %41 : vector<8x8x128xf32>
    %43 = arith.truncf %42 : vector<8x8x128xf32> to vector<8x8x128xbf16>
    %c1_27 = arith.constant 1 : index
    %c1_28 = arith.constant 1 : index
    %c0_29 = arith.constant 0 : index
    %44 = vector.load %arg7[%c1_27, %c1_28, %c0_29] : memref<10x10x128xbf16, #tpu.memory_space<vmem>>, vector<8x8x128xbf16>
    tpu.vector_store %arg7[%c1_27, %c1_28, %c0_29], %43 {strides = array<i32>} : memref<10x10x128xbf16, #tpu.memory_space<vmem>>, vector<8x8x128xbf16>,
    %c0_30 = arith.constant 0 : index
    %c0_31 = arith.constant 0 : index
    %c0_32 = arith.constant 0 : index
    %45 = vector.load %arg7[%c0_30, %c0_31, %c0_32] : memref<10x10x128xbf16, #tpu.memory_space<vmem>>, vector<10x8x128xbf16>
    %46 = vector.shape_cast %45 : vector<10x8x128xbf16> to vector<80x128xbf16>
    %c0_33 = arith.constant 0 : index
    %c1_34 = arith.constant 1 : index
    %c0_35 = arith.constant 0 : index
    %47 = vector.load %arg7[%c0_33, %c1_34, %c0_35] : memref<10x10x128xbf16, #tpu.memory_space<vmem>>, vector<10x8x128xbf16>
    %48 = vector.shape_cast %47 : vector<10x8x128xbf16> to vector<80x128xbf16>
    %c0_36 = arith.constant 0 : index
    %c2 = arith.constant 2 : index
    %c0_37 = arith.constant 0 : index
    %49 = vector.load %arg7[%c0_36, %c2, %c0_37] : memref<10x10x128xbf16, #tpu.memory_space<vmem>>, vector<10x8x128xbf16>
    %50 = vector.shape_cast %49 : vector<10x8x128xbf16> to vector<80x128xbf16>
    %51 = tpu.concatenate %46, %48 in 1 : vector<80x128xbf16>, vector<80x128xbf16> -> vector<80x256xbf16>
    %52 = tpu.concatenate %48, %50 in 1 : vector<80x128xbf16>, vector<80x128xbf16> -> vector<80x256xbf16>
    %c0_38 = arith.constant 0 : index
    %c0_39 = arith.constant 0 : index
    %53 = vector.load %arg5[%c0_38, %c0_39] : memref<1x128xf32, #tpu.memory_space<vmem>>, vector<1x128xf32>
    %54 = vector.shape_cast %53 : vector<1x128xf32> to vector<128xf32>
    %55 = vector.shape_cast %54 : vector<128xf32> to vector<1x128xf32>
    %56 = vector.broadcast %55 : vector<1x128xf32> to vector<64x128xf32>
    %57 = vector.extract_strided_slice %51 {offsets = [0, 0], sizes = [64, 256], strides = [1, 1]} : vector<80x256xbf16> to vector<64x256xbf16>
    %c0_40 = arith.constant 0 : index
    %c0_41 = arith.constant 0 : index
    %c0_42 = arith.constant 0 : index
    %c0_43 = arith.constant 0 : index
    %58 = vector.load %arg4[%c0_40, %c0_41, %c0_42, %c0_43] : memref<4x2x256x128xbf16, #tpu.memory_space<vmem>>, vector<1x1x256x128xbf16>
    %59 = vector.shape_cast %58 : vector<1x1x256x128xbf16> to vector<256x128xbf16>
    %cst_44 = arith.constant dense<0.000000e+00> : vector<64x128xf32>
    %60 = tpu.matmul %57, %59, %cst_44 {dimension_numbers = #tpu.dot_dimension_numbers<[1], [0], [0], [1], [0, 0, 1, 1], [], []>} : vector<64x256xbf16>, vector<256x128xbf16>, vector<64x128xf32> -> vector<64x128xf32>
    %61 = arith.addf %56, %60 : vector<64x128xf32>
    %62 = vector.extract_strided_slice %51 {offsets = [8, 0], sizes = [64, 256], strides = [1, 1]} : vector<80x256xbf16> to vector<64x256xbf16>
    %c0_45 = arith.constant 0 : index
    %c1_46 = arith.constant 1 : index
    %c0_47 = arith.constant 0 : index
    %c0_48 = arith.constant 0 : index
    %63 = vector.load %arg4[%c0_45, %c1_46, %c0_47, %c0_48] : memref<4x2x256x128xbf16, #tpu.memory_space<vmem>>, vector<1x1x256x128xbf16>
    %64 = vector.shape_cast %63 : vector<1x1x256x128xbf16> to vector<256x128xbf16>
    %cst_49 = arith.constant dense<0.000000e+00> : vector<64x128xf32>
    %65 = tpu.matmul %62, %64, %cst_49 {dimension_numbers = #tpu.dot_dimension_numbers<[1], [0], [0], [1], [0, 0, 1, 1], [], []>} : vector<64x256xbf16>, vector<256x128xbf16>, vector<64x128xf32> -> vector<64x128xf32>
    %66 = arith.addf %61, %65 : vector<64x128xf32>
    %67 = vector.shape_cast %66 : vector<64x128xf32> to vector<8x8x128xf32>
    %68 = arith.truncf %67 : vector<8x8x128xf32> to vector<8x8x128xbf16>
    %c0_50 = arith.constant 0 : index
    %c0_51 = arith.constant 0 : index
    %c0_52 = arith.constant 0 : index
    %c0_53 = arith.constant 0 : index
    %c0_54 = arith.constant 0 : index
    %c0_55 = arith.constant 0 : index
    %69 = vector.load %arg6[%c0_50, %c0_51, %c0_52, %c0_53, %c0_54, %c0_55] : memref<1x2x2x8x8x128xbf16, #tpu.memory_space<vmem>>, vector<1x1x1x8x8x128xbf16>
    %70 = vector.shape_cast %69 : vector<1x1x1x8x8x128xbf16> to vector<8x8x128xbf16>
    %71 = vector.shape_cast %68 : vector<8x8x128xbf16> to vector<1x1x1x8x8x128xbf16>
    tpu.vector_store %arg6[%c0_50, %c0_51, %c0_52, %c0_53, %c0_54, %c0_55], %71 {strides = array<i32>} : memref<1x2x2x8x8x128xbf16, #tpu.memory_space<vmem>>, vector<1x1x1x8x8x128xbf16>,
    %72 = vector.extract_strided_slice %52 {offsets = [0, 0], sizes = [64, 256], strides = [1, 1]} : vector<80x256xbf16> to vector<64x256xbf16>
    %c1_56 = arith.constant 1 : index
    %c0_57 = arith.constant 0 : index
    %c0_58 = arith.constant 0 : index
    %c0_59 = arith.constant 0 : index
    %73 = vector.load %arg4[%c1_56, %c0_57, %c0_58, %c0_59] : memref<4x2x256x128xbf16, #tpu.memory_space<vmem>>, vector<1x1x256x128xbf16>
    %74 = vector.shape_cast %73 : vector<1x1x256x128xbf16> to vector<256x128xbf16>
    %cst_60 = arith.constant dense<0.000000e+00> : vector<64x128xf32>
    %75 = tpu.matmul %72, %74, %cst_60 {dimension_numbers = #tpu.dot_dimension_numbers<[1], [0], [0], [1], [0, 0, 1, 1], [], []>} : vector<64x256xbf16>, vector<256x128xbf16>, vector<64x128xf32> -> vector<64x128xf32>
    %76 = arith.addf %56, %75 : vector<64x128xf32>
    %77 = vector.extract_strided_slice %52 {offsets = [8, 0], sizes = [64, 256], strides = [1, 1]} : vector<80x256xbf16> to vector<64x256xbf16>
    %c1_61 = arith.constant 1 : index
    %c1_62 = arith.constant 1 : index
    %c0_63 = arith.constant 0 : index
    %c0_64 = arith.constant 0 : index
    %78 = vector.load %arg4[%c1_61, %c1_62, %c0_63, %c0_64] : memref<4x2x256x128xbf16, #tpu.memory_space<vmem>>, vector<1x1x256x128xbf16>
    %79 = vector.shape_cast %78 : vector<1x1x256x128xbf16> to vector<256x128xbf16>
    %cst_65 = arith.constant dense<0.000000e+00> : vector<64x128xf32>
    %80 = tpu.matmul %77, %79, %cst_65 {dimension_numbers = #tpu.dot_dimension_numbers<[1], [0], [0], [1], [0, 0, 1, 1], [], []>} : vector<64x256xbf16>, vector<256x128xbf16>, vector<64x128xf32> -> vector<64x128xf32>
    %81 = arith.addf %76, %80 : vector<64x128xf32>
    %82 = vector.shape_cast %81 : vector<64x128xf32> to vector<8x8x128xf32>
    %83 = arith.truncf %82 : vector<8x8x128xf32> to vector<8x8x128xbf16>
    %c0_66 = arith.constant 0 : index
    %c0_67 = arith.constant 0 : index
    %c1_68 = arith.constant 1 : index
    %c0_69 = arith.constant 0 : index
    %c0_70 = arith.constant 0 : index
    %c0_71 = arith.constant 0 : index
    %84 = vector.load %arg6[%c0_66, %c0_67, %c1_68, %c0_69, %c0_70, %c0_71] : memref<1x2x2x8x8x128xbf16, #tpu.memory_space<vmem>>, vector<1x1x1x8x8x128xbf16>
    %85 = vector.shape_cast %84 : vector<1x1x1x8x8x128xbf16> to vector<8x8x128xbf16>
    %86 = vector.shape_cast %83 : vector<8x8x128xbf16> to vector<1x1x1x8x8x128xbf16>
    tpu.vector_store %arg6[%c0_66, %c0_67, %c1_68, %c0_69, %c0_70, %c0_71], %86 {strides = array<i32>} : memref<1x2x2x8x8x128xbf16, #tpu.memory_space<vmem>>, vector<1x1x1x8x8x128xbf16>,
    %87 = vector.extract_strided_slice %51 {offsets = [8, 0], sizes = [64, 256], strides = [1, 1]} : vector<80x256xbf16> to vector<64x256xbf16>
    %c2_72 = arith.constant 2 : index
    %c0_73 = arith.constant 0 : index
    %c0_74 = arith.constant 0 : index
    %c0_75 = arith.constant 0 : index
    %88 = vector.load %arg4[%c2_72, %c0_73, %c0_74, %c0_75] : memref<4x2x256x128xbf16, #tpu.memory_space<vmem>>, vector<1x1x256x128xbf16>
    %89 = vector.shape_cast %88 : vector<1x1x256x128xbf16> to vector<256x128xbf16>
    %cst_76 = arith.constant dense<0.000000e+00> : vector<64x128xf32>
    %90 = tpu.matmul %87, %89, %cst_76 {dimension_numbers = #tpu.dot_dimension_numbers<[1], [0], [0], [1], [0, 0, 1, 1], [], []>} : vector<64x256xbf16>, vector<256x128xbf16>, vector<64x128xf32> -> vector<64x128xf32>
    %91 = arith.addf %56, %90 : vector<64x128xf32>
    %92 = vector.extract_strided_slice %51 {offsets = [16, 0], sizes = [64, 256], strides = [1, 1]} : vector<80x256xbf16> to vector<64x256xbf16>
    %c2_77 = arith.constant 2 : index
    %c1_78 = arith.constant 1 : index
    %c0_79 = arith.constant 0 : index
    %c0_80 = arith.constant 0 : index
    %93 = vector.load %arg4[%c2_77, %c1_78, %c0_79, %c0_80] : memref<4x2x256x128xbf16, #tpu.memory_space<vmem>>, vector<1x1x256x128xbf16>
    %94 = vector.shape_cast %93 : vector<1x1x256x128xbf16> to vector<256x128xbf16>
    %cst_81 = arith.constant dense<0.000000e+00> : vector<64x128xf32>
    %95 = tpu.matmul %92, %94, %cst_81 {dimension_numbers = #tpu.dot_dimension_numbers<[1], [0], [0], [1], [0, 0, 1, 1], [], []>} : vector<64x256xbf16>, vector<256x128xbf16>, vector<64x128xf32> -> vector<64x128xf32>
    %96 = arith.addf %91, %95 : vector<64x128xf32>
    %97 = vector.shape_cast %96 : vector<64x128xf32> to vector<8x8x128xf32>
    %98 = arith.truncf %97 : vector<8x8x128xf32> to vector<8x8x128xbf16>
    %c0_82 = arith.constant 0 : index
    %c1_83 = arith.constant 1 : index
    %c0_84 = arith.constant 0 : index
    %c0_85 = arith.constant 0 : index
    %c0_86 = arith.constant 0 : index
    %c0_87 = arith.constant 0 : index
    %99 = vector.load %arg6[%c0_82, %c1_83, %c0_84, %c0_85, %c0_86, %c0_87] : memref<1x2x2x8x8x128xbf16, #tpu.memory_space<vmem>>, vector<1x1x1x8x8x128xbf16>
    %100 = vector.shape_cast %99 : vector<1x1x1x8x8x128xbf16> to vector<8x8x128xbf16>
    %101 = vector.shape_cast %98 : vector<8x8x128xbf16> to vector<1x1x1x8x8x128xbf16>
    tpu.vector_store %arg6[%c0_82, %c1_83, %c0_84, %c0_85, %c0_86, %c0_87], %101 {strides = array<i32>} : memref<1x2x2x8x8x128xbf16, #tpu.memory_space<vmem>>, vector<1x1x1x8x8x128xbf16>,
    %102 = vector.extract_strided_slice %52 {offsets = [8, 0], sizes = [64, 256], strides = [1, 1]} : vector<80x256xbf16> to vector<64x256xbf16>
    %c3 = arith.constant 3 : index
    %c0_88 = arith.constant 0 : index
    %c0_89 = arith.constant 0 : index
    %c0_90 = arith.constant 0 : index
    %103 = vector.load %arg4[%c3, %c0_88, %c0_89, %c0_90] : memref<4x2x256x128xbf16, #tpu.memory_space<vmem>>, vector<1x1x256x128xbf16>
    %104 = vector.shape_cast %103 : vector<1x1x256x128xbf16> to vector<256x128xbf16>
    %cst_91 = arith.constant dense<0.000000e+00> : vector<64x128xf32>
    %105 = tpu.matmul %102, %104, %cst_91 {dimension_numbers = #tpu.dot_dimension_numbers<[1], [0], [0], [1], [0, 0, 1, 1], [], []>} : vector<64x256xbf16>, vector<256x128xbf16>, vector<64x128xf32> -> vector<64x128xf32>
    %106 = arith.addf %56, %105 : vector<64x128xf32>
    %107 = vector.extract_strided_slice %52 {offsets = [16, 0], sizes = [64, 256], strides = [1, 1]} : vector<80x256xbf16> to vector<64x256xbf16>
    %c3_92 = arith.constant 3 : index
    %c1_93 = arith.constant 1 : index
    %c0_94 = arith.constant 0 : index
    %c0_95 = arith.constant 0 : index
    %108 = vector.load %arg4[%c3_92, %c1_93, %c0_94, %c0_95] : memref<4x2x256x128xbf16, #tpu.memory_space<vmem>>, vector<1x1x256x128xbf16>
    %109 = vector.shape_cast %108 : vector<1x1x256x128xbf16> to vector<256x128xbf16>
    %cst_96 = arith.constant dense<0.000000e+00> : vector<64x128xf32>
    %110 = tpu.matmul %107, %109, %cst_96 {dimension_numbers = #tpu.dot_dimension_numbers<[1], [0], [0], [1], [0, 0, 1, 1], [], []>} : vector<64x256xbf16>, vector<256x128xbf16>, vector<64x128xf32> -> vector<64x128xf32>
    %111 = arith.addf %106, %110 : vector<64x128xf32>
    %112 = vector.shape_cast %111 : vector<64x128xf32> to vector<8x8x128xf32>
    %113 = arith.truncf %112 : vector<8x8x128xf32> to vector<8x8x128xbf16>
    %c0_97 = arith.constant 0 : index
    %c1_98 = arith.constant 1 : index
    %c1_99 = arith.constant 1 : index
    %c0_100 = arith.constant 0 : index
    %c0_101 = arith.constant 0 : index
    %c0_102 = arith.constant 0 : index
    %114 = vector.load %arg6[%c0_97, %c1_98, %c1_99, %c0_100, %c0_101, %c0_102] : memref<1x2x2x8x8x128xbf16, #tpu.memory_space<vmem>>, vector<1x1x1x8x8x128xbf16>
    %115 = vector.shape_cast %114 : vector<1x1x1x8x8x128xbf16> to vector<8x8x128xbf16>
    %116 = vector.shape_cast %113 : vector<8x8x128xbf16> to vector<1x1x1x8x8x128xbf16>
    tpu.vector_store %arg6[%c0_97, %c1_98, %c1_99, %c0_100, %c0_101, %c0_102], %116 {strides = array<i32>} : memref<1x2x2x8x8x128xbf16, #tpu.memory_space<vmem>>, vector<1x1x1x8x8x128xbf16>,
    return
  }
  func.func @transform_0(%arg0: i32, %arg1: i32) -> (i32, i32, i32, i32) {
    %c0_i32 = arith.constant 0 : i32
    %c0_i32_0 = arith.constant 0 : i32
    %c0_i32_1 = arith.constant 0 : i32
    return %arg0, %arg1, %c0_i32, %c0_i32_0 : i32, i32, i32, i32
  }
  func.func @transform_1(%arg0: i32, %arg1: i32) -> (i32, i32, i32, i32, i32) {
    %c0_i32 = arith.constant 0 : i32
    %c0_i32_0 = arith.constant 0 : i32
    %c0_i32_1 = arith.constant 0 : i32
    %c0_i32_2 = arith.constant 0 : i32
    return %arg0, %arg1, %c0_i32, %c0_i32_0, %c0_i32_1 : i32, i32, i32, i32, i32
  }
  func.func @transform_2(%arg0: i32, %arg1: i32) -> (i32, i32, i32, i32) {
    %c0_i32 = arith.constant 0 : i32
    %c0_i32_0 = arith.constant 0 : i32
    %c0_i32_1 = arith.constant 0 : i32
    %c0_i32_2 = arith.constant 0 : i32
    %c0_i32_3 = arith.constant 0 : i32
    return %c0_i32, %c0_i32_0, %c0_i32_1, %c0_i32_2 : i32, i32, i32, i32
  }
  func.func @transform_3(%arg0: i32, %arg1: i32) -> (i32, i32) {
    %c0_i32 = arith.constant 0 : i32
    %c0_i32_0 = arith.constant 0 : i32
    %c0_i32_1 = arith.constant 0 : i32
    return %c0_i32, %c0_i32_0 : i32, i32
  }
  func.func @transform_4(%arg0: i32, %arg1: i32) -> (i32, i32, i32, i32, i32, i32) {
    %c0_i32 = arith.constant 0 : i32
    %c0_i32_0 = arith.constant 0 : i32
    %c0_i32_1 = arith.constant 0 : i32
    %c0_i32_2 = arith.constant 0 : i32
    %c0_i32_3 = arith.constant 0 : i32
    return %arg0, %c0_i32, %c0_i32_0, %arg1, %c0_i32_1, %c0_i32_2 : i32, i32, i32, i32, i32, i32
  }
}

</mosaic_0001>

<bundles_post_ra>
// kernel: _lambda_.1
= control target key start
LH: loop header
LB: loop body
LE: loop exit
PB: predicated region body
PF: predicated region fallthrough
CT: control target
= control target key end

     0   :  { %s4116_s15 = smov 0   ;;  %s4118_s16 = smov 0   ;;  %s5322_s0 = inlined_call_operand.vmem [shape: f32[2,16,8,128], index: 0, kind: input, shape index: {}]   ;;  %s5323_s1 = inlined_call_operand.vmem [shape: f32[2,2,2,8,128], index: 1, kind: input, shape index: {}]   ;;  %s5324_s2 = inlined_call_operand.vmem [shape: bf16[4,2,256,128], index: 2, kind: input, shape index: {}]   ;;  %s5325_s3 = inlined_call_operand.vmem [shape: f32[1,128], index: 3, kind: input, shape index: {}]   ;;  %s5326_s4 = inlined_call_operand.vmem [shape: bf16[2,2,2,16,8,128], index: 4, kind: output, shape index: {}]  }
   0x1   :  { %s4120_s17 = smov 0   ;;  %s4122_s18 = smov 0  }
   0x2   :  { %s4124_s19 = smov 0   ;;  %s4126_s20 = smov 0  }
   0x3   :  { %s4128_s21 = smov 0  }
   0x4 LB: > { %s23_s22 = sadd.s32 1, %s4080_s19  ;;  %s26_s23 = sadd.s32 1, %s4084_s20  ;;  %s4088_s21 = sphi %s4128_s21, %s14_s21   ;;  %s4084_s20 = sphi %s4126_s20, %s5359_s20   ;;  %s4080_s19 = sphi %s4124_s19, %s5358_s19   ;;  %s4076_s18 = sphi %s4122_s18, %s5357_s18   ;;  %s4072_s17 = sphi %s4120_s17, %s5356_s17   ;;  %s4068_s16 = sphi %s4118_s16, %s5355_s16   ;;  %s4064_s15 = sphi %s4116_s15, %s5354_s15  }
   0x5   : > { %p24_p0 = scmp.ge.s32.totalorder %s23_s22, 2  ;;  %s2918_s24 = sadd.s32 4294967295, %s4088_s21  }
   0x6   : > { %p143_p1 = scmp.ne.s32.totalorder %s4068_s16, %s4064_s15  ;;  %p144_p2 = scmp.eq.s32.totalorder %s2918_s24, 3 }
   0x7   : > { %s5361_s22 = smov (%p24_p0, %s23_s22), 0  ;;  %s5363_s23 = smov (!%p24_p0, %s26_s23), %s4084_s20 }
   0x8   : > { %s129_s25 = ssub.s32 %s4080_s19, %s5361_s22  ;;  %p28_p3 = scmp.ge.s32.totalorder %s5363_s23, 2 }
   0x9   : > { %p2922_p4 = scmp.ge.s32.totalorder %s4088_s21, 1  ;;  %p4162_p5 = por %p144_p2, %p143_p1 }
   0xa   : > { %p199_p6 = scmp.lt.s32.totalorder %s4088_s21, 5  ;;  %s5365_s23 = smov (%p28_p3, %s5363_s23), 0 }
   0xb   : > { %s128_s27 = ssub.s32 %s4084_s20, %s5365_s23  ;;  %s133_s29 = sadd.s32 1, %s4068_s16 }
   0xc   : > { %p200_p7 = pnand %p2922_p4, %p199_p6  ;;  %s130_s28 = sor.u32 %s129_s25, %s128_s27 }
   0xd   : > { %p131_p8 = scmp.eq.s32.totalorder %s130_s28, 0  ;;  %p238_p9 = scmp.lt.s32.totalorder (!%p200_p7), %s4076_s18, 1 }
   0xe   : > { %203 = sbr.rel (%p200_p7) target bundleno = 622 (0x26e), region = 36  ;;  %p249_p10 = scmp.lt.s32.totalorder (!%p200_p7), %s4072_s17, 1 }
   0xf   : > { %s4173_s30 = scalar_select %p131_p8, %s4068_s16, %s133_s29  }
  0x10   : > { %s4178_s5 = sshll.u32 (!%p200_p7), %s4072_s17, 3  ;;  %s234_s28 = sand.u32 (!%p200_p7), 1, %s4064_s15  }
  0x11   : > { %p240_p11 = scmp.lt.s32.totalorder (!%p200_p7), %s4178_s5, 15 }
  0x13   : > { %s239_s6 = scalar_select %p238_p9, %s4076_s18, 1  ;;  %vm258_vm0 = vcmask 1040384   ;;  %vm259_vm1 = vsmask.f32 256  ;;  %v261_v1 = vld [vmem:[#allocation2] sm:$0x1] }
  0x14   : > { %s5367_s17 = smov (!%p249_p10, %s4072_s17), 1  ;;  %vm4183_vm2 = vmand %vm258_vm0, %vm259_vm1  ;;  %vm291_vm3 = vsmask.f32 7938  ;;  %v293_v4 = vld [vmem:[#allocation2 + $0x4] sm:$0x1]  ;;  %v4090_v26 = vmov 128.0  }
  0x15   : > { %s2928_s7 = sshll.u32 %s239_s6, 2  ;;  %s2927_s8 = sshll.u32 %s5367_s17, 1  ;;  %v262_v2 = vsel %vm4183_vm2, 0, %v261_v1  ;;  %vm4190_vm4 = vmand %vm258_vm0, %vm291_vm3  ;;  %4012 = vrcp.f32 %v4090_v26  ;;  %v273_v32 = vld [vmem:[#allocation2 + $0x20] sm:$0x1]  ;;  %v3738_v43 = vld [vmem:[%s5324_s2 + $0x38] sm:$0xff] }
  0x16   : > { %s253_s9 = sadd.s32 %s2928_s7, %s2927_s8  ;;  %263 = vst [vmem:[#allocation2] sm:$0x1] %v262_v2  ;;  %v294_v5 = vsel %vm4190_vm4, 0, %v293_v4  ;;  %s2925_s14 = sshll.u32 %s239_s6, 4  ;;  %v305_v33 = vld [vmem:[#allocation2 + $0x24] sm:$0x1]  ;;  %1112 = vmatpush.bf16.msra.mxu0 %v3738_v43 }
  0x17   : > { %s2929_s10 = sshll.u32 %s253_s9, 3  ;;  %295 = vst [vmem:[#allocation2 + $0x4] sm:$0x1] %v294_v5  ;;  %v274_v34 = vsel %vm4183_vm2, 0, %v273_v32  ;;  %v306_v35 = vsel %vm4190_vm4, 0, %v305_v33  ;;  %v3754_v47 = vld [vmem:[%s5324_s2 + $0xb8] sm:$0xff] }
  0x18   : > { %s255_s13 = scalar_lea.vmem %s5323_s1, %s2929_s10  ;;  %v267_v36 = vld [vmem:[#allocation2 + $0x10] sm:$0x1]  ;;  %v299_v37 = vld [vmem:[#allocation2 + $0x14] sm:$0x1]  ;;  %275 = vst [vmem:[#allocation2 + $0x20] sm:$0x1] %v274_v34  ;;  %1333 = vmatpush.bf16.msra.mxu2 %v3754_v47 }
  0x19   : > { %v4199_v6 = vld [vmem:[%s255_s13] sm:$0xff]  ;;  %s241_s17 = scalar_select %p240_p11, %s4178_s5, 15  ;;  %v4235_v21 = vld [vmem:[%s255_s13 + $0x8] sm:$0xff]  ;;  %v268_v39 = vsel %vm4183_vm2, 0, %v267_v36  ;;  %v300_v40 = vsel %vm4190_vm4, 0, %v299_v37  ;;  %vm359_vm8 = vcmask 1043456  }
  0x1a   : > { %v325_v7 = vmul.f32 %v4199_v6, %v4199_v6  ;;  %v367_v23 = vmul.f32 %v4235_v21, %v4235_v21  ;;  %307 = vst [vmem:[#allocation2 + $0x24] sm:$0x1] %v306_v35  ;;  %v276_v50 = vld [vmem:[#allocation2 + $0x28] sm:$0x1]  ;;  %v308_v51 = vld [vmem:[#allocation2 + $0x2c] sm:$0x1] }
  0x1b   : > { %s243_s24 = sadd.s32 %s2925_s14, %s241_s17  ;;  %v4013_v27 = vpop.eup %4012  ;;  %269 = vst [vmem:[#allocation2 + $0x10] sm:$0x1] %v268_v39  ;;  %v277_v55 = vsel %vm4183_vm2, 0, %v276_v50  ;;  %v309_v56 = vsel %vm4190_vm4, 0, %v308_v51  ;;  %v270_v57 = vld [vmem:[#allocation2 + $0x18] sm:$0x1] }
  0x1c   : > { %326 = vadd.xlane.f32.xlu0 %v325_v7  ;;  %s2926_s25 = sshll.u32 %s243_s24, 3  ;;  %v329_v28 = vmul.f32 128.0, %v4013_v27  ;;  %vm333_vm5 = vweird.f32 %v4013_v27  ;;  %301 = vst [vmem:[#allocation2 + $0x14] sm:$0x1] %v300_v40  ;;  %v302_v58 = vld [vmem:[#allocation2 + $0x1c] sm:$0x1] }
  0x1d   : > { %s245_s29 = scalar_lea.vmem %s5322_s0, %s2926_s25  ;;  %278 = vst [vmem:[#allocation2 + $0x28] sm:$0x1] %v277_v55  ;;  %v271_v60 = vsel %vm4183_vm2, 0, %v270_v57  ;;  %v264_v61 = vld [vmem:[#allocation2 + $0x8] sm:$0x1]  ;;  %v303_v63 = vsel %vm4190_vm4, 0, %v302_v58 }
  0x1e   : > { %v4209_v8 = vld [vmem:[%s245_s29 + $0x18] sm:$0xff]  ;;  %v4211_v9 = vld [vmem:[%s245_s29 + $0x8] sm:$0xff]  ;;  %v4217_v12 = vld [vmem:[%s245_s29] sm:$0xff]  ;;  %v330_v29 = vsub.f32 1.0, %v329_v28  ;;  %310 = vst [vmem:[#allocation2 + $0x2c] sm:$0x1] %v309_v56 }
  0x1f   : > { %v412_v10 = vmul.f32 %v4209_v8, %v4209_v8  ;;  %v410_v11 = vmul.f32 %v4211_v9, %v4211_v9  ;;  %v409_v13 = vmul.f32 %v4217_v12, %v4217_v12  ;;  %v4221_v14 = vld [vmem:[%s245_s29 + $0x20] sm:$0xff]  ;;  %v4223_v15 = vld [vmem:[%s245_s29 + $0x10] sm:$0xff]  ;;  %v4229_v18 = vld [vmem:[%s245_s29 + $0x28] sm:$0xff]  ;;  %v265_v1 = vsel %vm4183_vm2, 0, %v264_v61  ;;  %272 = vst [vmem:[#allocation2 + $0x18] sm:$0x1] %v271_v60 }
  0x20   : > { %v413_v16 = vmul.f32 %v4221_v14, %v4221_v14  ;;  %v411_v17 = vmul.f32 %v4223_v15, %v4223_v15  ;;  %v414_v19 = vmul.f32 %v4229_v18, %v4229_v18  ;;  %v4233_v20 = vld [vmem:[%s245_s29 + $0x30] sm:$0xff]  ;;  %v4241_v24 = vld [vmem:[%s245_s29 + $0x38] sm:$0xff]  ;;  %v331_v30 = vmul.f32 %v4013_v27, %v330_v29  ;;  %v296_v2 = vld [vmem:[#allocation2 + $0xc] sm:$0x1]  ;;  %304 = vst [vmem:[#allocation2 + $0x1c] sm:$0x1] %v303_v63 }
  0x21   : > { %423 = vadd.xlane.f32.xlu2 %v412_v10  ;;  %419 = vadd.xlane.f32.xlu1 %v410_v11  ;;  %v415_v22 = vmul.f32 %v4233_v20, %v4233_v20  ;;  %v416_v25 = vmul.f32 %v4241_v24, %v4241_v24  ;;  %v297_v5 = vsel %vm4190_vm4, 0, %v296_v2  ;;  %266 = vst [vmem:[#allocation2 + $0x8] sm:$0x1] %v265_v1  ;;  %v279_v34 = vld [vmem:[#allocation2 + $0x30] sm:$0x1]  ;;  %v3752_v63 = vld [vmem:[%s5324_s2 + $0xa8] sm:$0xff] }
  0x22   : > { %v332_v31 = vadd.f32 %v4013_v27, %v331_v30  ;;  %298 = vst [vmem:[#allocation2 + $0xc] sm:$0x1] %v297_v5  ;;  %v282_v30 = vld [vmem:[#allocation2 + $0x38] sm:$0x1]  ;;  %v311_v36 = vld [vmem:[#allocation2 + $0x34] sm:$0x1] }
  0x23   : > { %v280_v50 = vsel %vm4183_vm2, 0, %v279_v34  ;;  %v312_v55 = vsel %vm4190_vm4, 0, %v311_v36  ;;  %v3739_v3 = vld [vmem:[%s5324_s2 + $0x40] sm:$0xff]  ;;  %s2923_s7 = sshll.u32 %s234_s28, 7  ;;  %s3722_s11 = sshll.u32 (%p4162_p5), %s4076_s18, 6 }
  0x24   : > { %417 = vadd.xlane.f32.xlu0 %v409_v13  ;;  %v4249_v38 = vsel %vm333_vm5, %v4013_v27, %v332_v31  ;;  %v3737_v27 = vld [vmem:[%s5324_s2 + $0x30] sm:$0xff]  ;;  %v314_v31 = vld [vmem:[#allocation2 + $0x3c] sm:$0x1]  ;;  %281 = vst [vmem:[#allocation2 + $0x30] sm:$0x1] %v280_v50  ;;  %v3748_v50 = vld [vmem:[%s5324_s2 + $0x88] sm:$0xff]  ;;  %s2658_s12 = sadd.s32 (%p4162_p5), %s3722_s11, %s4178_s5 }
  0x25   : > { %1113 = vmatpush.bf16.msra.mxu0 %v3737_v27  ;;  %v315_v43 = vsel %vm4190_vm4, 0, %v314_v31  ;;  %313 = vst [vmem:[#allocation2 + $0x34] sm:$0x1] %v312_v55  ;;  %v3751_v31 = vld [vmem:[%s5324_s2 + $0xa0] sm:$0xff]  ;;  %s5174_s15 = scalar_lea.vmem [#allocation3], %s2923_s7  ;;  %s3723_s13 = sshll.u32 (%p4162_p5), %s2658_s12, 2 }
  0x26   : > { %316 = vst [vmem:[#allocation2 + $0x3c] sm:$0x1] %v315_v43  ;;  %s2660_s26 = scalar_lea.vmem (%p4162_p5), %s5326_s4, %s3723_s13 }
  0x29   : > { %425 = vadd.xlane.f32.xlu2 %v413_v16  ;;  %421 = vadd.xlane.f32.xlu1 %v411_v17 }
  0x2c   : > { %427 = vadd.xlane.f32.xlu0 %v414_v19 }
  0x31   : > { %429 = vadd.xlane.f32.xlu1 %v415_v22  ;;  %368 = vadd.xlane.f32.xlu2 %v367_v23 }
  0x34   : > { %431 = vadd.xlane.f32.xlu0 %v416_v25 }
  0x8f   : > { %v327_v41 = vpop.xlane.xlu0 %326 }
  0x90   : > { %v335_v42 = vmul.f32 %v4249_v38, %v327_v41 }
  0x92   : > { %v4259_v44 = vadd.f32 1e-05, %v335_v42  ;;  %v283_v42 = vsel %vm4183_vm2, 0, %v282_v30  ;;  %v3745_v30 = vld [vmem:[%s5324_s2 + $0x70] sm:$0xff] }
  0x93   : > { %284 = vst [vmem:[#allocation2 + $0x38] sm:$0x1] %v283_v42 }
  0x94   : > { %4014 = vrsqrt.f32 %v4259_v44  ;;  %v424_v45 = vpop.xlane.xlu2 %423  ;;  %v420_v46 = vpop.xlane.xlu1 %419  ;;  %vm343_vm6 = vweird.f32 %v4259_v44 }
  0x95   : > { %v436_v48 = vmul.f32 %v424_v45, %v4249_v38  ;;  %v434_v49 = vmul.f32 %v420_v46, %v4249_v38  ;;  %v3753_v45 = vld [vmem:[%s5324_s2 + $0xb0] sm:$0xff]  ;;  %v3736_v46 = vld [vmem:[%s5324_s2 + $0x28] sm:$0xff] }
  0x96   : > { %1334 = vmatpush.bf16.msra.mxu2 %v3753_v45  ;;  %1114 = vmatpush.bf16.msra.mxu0 %v3736_v46  ;;  %v3761_v46 = vld [vmem:[%s5324_s2 + $0xf0] sm:$0xff] }
  0x97   : > { %v4267_v52 = vadd.f32 1e-05, %v436_v48  ;;  %v4269_v53 = vadd.f32 1e-05, %v434_v49  ;;  %v418_v54 = vpop.xlane.xlu0 %417 }
  0x98   : > { %v433_v59 = vmul.f32 %v418_v54, %v4249_v38 }
  0x99   : > { %4016 = vrsqrt.f32 %v4267_v52  ;;  %vm485_vm7 = vweird.f32 %v4267_v52  ;;  %vm465_vm10 = vweird.f32 %v4269_v53 }
  0x9a   : > { %v4279_v62 = vpop.eup %4014  ;;  %4018 = vrsqrt.f32 %v4269_v53  ;;  %v4290_v7 = vadd.f32 1e-05, %v433_v59  ;;  %v3746_v59 = vld [vmem:[%s5324_s2 + $0x78] sm:$0xff]  ;;  %1335 = vmatpush.bf16.msra.mxu2 %v3752_v63 }
  0x9b   : > { %v338_v4 = vmul.f32 %v4279_v62, %v4259_v44  ;;  %vm344_vm9 = vweird.f32 %v4279_v62  ;;  %1141 = vmatpush.bf16.msra.mxu1 %v3746_v59 }
  0x9c   : > { %v426_v10 = vpop.xlane.xlu2 %425  ;;  %v422_v11 = vpop.xlane.xlu1 %421  ;;  %4020 = vrsqrt.f32 %v4290_v7  ;;  %vm345_vm11 = vmor %vm343_vm6, %vm344_vm9  ;;  %vm455_vm13 = vweird.f32 %v4290_v7 }
  0x9d   : > { %v339_v13 = vmul.f32 %v4279_v62, %v338_v4  ;;  %v437_v16 = vmul.f32 %v426_v10, %v4249_v38  ;;  %v435_v17 = vmul.f32 %v422_v11, %v4249_v38  ;;  %v3735_v10 = vld [vmem:[%s5324_s2 + $0x20] sm:$0xff]  ;;  %vm4410_vm9 = vmand %vm359_vm8, %vm291_vm3 }
  0x9e   : > { %1115 = vmatpush.bf16.msra.mxu0 %v3735_v10  ;;  %1336 = vmatpush.bf16.msra.mxu2 %v3751_v31  ;;  %v632_v10 = vld [vmem:[#allocation2 + $0x10] sm:$0xf] }
  0x9f   : > { %v4296_v19 = vpop.eup %4016  ;;  %v340_v22 = vmul.f32 0.5, %v339_v13  ;;  %v4298_v23 = vadd.f32 1e-05, %v437_v16  ;;  %v4300_v25 = vadd.f32 1e-05, %v435_v17  ;;  %v428_v26 = vpop.xlane.xlu0 %427  ;;  %v3762_v17 = vld [vmem:[%s5324_s2 + $0xf8] sm:$0xff]  ;;  %1142 = vmatpush.bf16.msra.mxu1 %v3745_v30 }
  0xa0   : > { %v4305_v28 = vpop.eup %4018  ;;  %v480_v29 = vmul.f32 %v4296_v19, %v4267_v52  ;;  %v438_v37 = vmul.f32 %v428_v26, %v4249_v38  ;;  %vm486_vm12 = vweird.f32 %v4296_v19  ;;  %1362 = vmatpush.bf16.msra.mxu3 %v3762_v17  ;;  %v3743_v30 = vld [vmem:[%s5324_s2 + $0x60] sm:$0xff] }
  0xa1   : > { %v341_v32 = vsub.f32 1.5, %v340_v22  ;;  %v460_v33 = vmul.f32 %v4305_v28, %v4269_v53  ;;  %4022 = vrsqrt.f32 %v4298_v23  ;;  %vm466_vm14 = vweird.f32 %v4305_v28  ;;  %vm4359_vm15 = vmor %vm485_vm7, %vm486_vm12  ;;  %v3734_v53 = vld [vmem:[%s5324_s2 + $0x18] sm:$0xff] }
  0xa2   : > { %v481_v35 = vmul.f32 %v4296_v19, %v480_v29  ;;  %4024 = vrsqrt.f32 %v4300_v25  ;;  %v4319_v39 = vpop.eup %4020  ;;  %vm495_vm0 = vweird.f32 %v4298_v23  ;;  %vm475_vm6 = vweird.f32 %v4300_v25  ;;  %vm467_vm7 = vmor %vm465_vm10, %vm466_vm14  ;;  %1116 = vmatpush.bf16.msra.mxu0 %v3734_v53 }
  0xa3   : > { %v342_v40 = vmul.f32 %v4279_v62, %v341_v32  ;;  %v461_v41 = vmul.f32 %v4305_v28, %v460_v33  ;;  %v450_v48 = vmul.f32 %v4319_v39, %v4290_v7  ;;  %vm456_vm1 = vweird.f32 %v4319_v39  ;;  %v3750_v7 = vld [vmem:[%s5324_s2 + $0x98] sm:$0xff] }
  0xa4   : > { %v482_v47 = vmul.f32 0.5, %v481_v35  ;;  %v430_v49 = vpop.xlane.xlu1 %429  ;;  %v369_v45 = vpop.xlane.xlu2 %368  ;;  %vm4425_vm3 = vmor %vm455_vm13, %vm456_vm1  ;;  %1363 = vmatpush.bf16.msra.mxu3 %v3761_v46  ;;  %1337 = vmatpush.bf16.msra.mxu2 %v3750_v7  ;;  %v285_v46 = vld [vmem:[#allocation2 + $0x40] sm:$0x1]  ;;  %v653_v7 = vld [vmem:[#allocation2 + $0x2c] sm:$0x1] }
  0xa5   : > { %v346_v51 = vsel %vm345_vm11, %v4279_v62, %v342_v40  ;;  %v462_v54 = vmul.f32 0.5, %v461_v41  ;;  %v439_v44 = vmul.f32 %v430_v49, %v4249_v38  ;;  %v451_v58 = vmul.f32 %v4319_v39, %v450_v48  ;;  %v364_v40 = vld [vmem:[#allocation2 + $0x4] sm:$0x1] }
  0xa6   : > { %v347_v56 = vmul.f32 %v346_v51, %v4199_v6  ;;  %v483_v57 = vsub.f32 1.5, %v482_v47  ;;  %v4365_v62 = vadd.f32 1e-05, %v438_v37  ;;  %v288_v51 = vld [vmem:[#allocation2 + $0x48] sm:$0x1] }
  0xa7   : > { %v4353_v60 = vpop.eup %4022  ;;  %v463_v6 = vsub.f32 1.5, %v462_v54  ;;  %v4375_v5 = vadd.f32 1e-05, %v439_v44  ;;  %v452_v16 = vmul.f32 0.5, %v451_v58  ;;  %v3733_v58 = vld [vmem:[%s5324_s2 + $0x10] sm:$0xff] }
  0xa8   : > { %v4370_v1 = vpop.eup %4024  ;;  %v348_v2 = vpack.c.bf16 %v347_v56, %v347_v56  ;;  %v484_v52 = vmul.f32 %v4296_v19, %v483_v57  ;;  %v490_v4 = vmul.f32 %v4353_v60, %v4298_v23  ;;  %vm496_vm5 = vweird.f32 %v4353_v60  ;;  %v3744_v57 = vld [vmem:[%s5324_s2 + $0x68] sm:$0xff]  ;;  %1117 = vmatpush.bf16.msra.mxu0 %v3733_v58  ;;  %v638_v58 = vld [vmem:[#allocation2 + $0x18] sm:$0xf] }
  0xa9   : > { %v464_v11 = vmul.f32 %v4305_v28, %v463_v6  ;;  %v470_v13 = vmul.f32 %v4370_v1, %v4300_v25  ;;  %v453_v34 = vsub.f32 1.5, %v452_v16  ;;  %4026 = vrsqrt.f32 %v4375_v5  ;;  %v647_v6 = vld [vmem:[#allocation2 + $0x24] sm:$0x1]  ;;  %vm4449_vm11 = vmor %vm495_vm0, %vm496_vm5  ;;  %1143 = vmatpush.bf16.msra.mxu1 %v3744_v57  ;;  %v3760_v23 = vld [vmem:[%s5324_s2 + $0xe8] sm:$0xff] }
  0xaa   : > { %v350_v22 = vshrl.u32 %v348_v2, 16  ;;  %v353_v26 = vshll.u32 %v348_v2, 16  ;;  %v488_v27 = vsel %vm4359_vm15, %v4296_v19, %v484_v52  ;;  %v491_v29 = vmul.f32 %v4353_v60, %v490_v4  ;;  %1364 = vmatpush.bf16.msra.mxu3 %v3760_v23  ;;  %v650_v57 = vld [vmem:[#allocation2 + $0x28] sm:$0xf] }
  0xab   : > { %v532_v32 = vmul.f32 %v488_v27, %v4209_v8  ;;  %v468_v19 = vsel %vm467_vm7, %v4305_v28, %v464_v11  ;;  %v471_v33 = vmul.f32 %v4370_v1, %v470_v13  ;;  %v361_v28 = vld [vmem:[#allocation2] sm:$0xf]  ;;  %vm476_vm10 = vweird.f32 %v4370_v1  ;;  %v635_v11 = vld [vmem:[#allocation2 + $0x14] sm:$0x1] }
  0xac   : > { %v352_v36 = vrot.slane %v350_v22, 7  ;;  %v530_v37 = vmul.f32 %v468_v19, %v4211_v9  ;;  %v492_v8 = vmul.f32 0.5, %v491_v29  ;;  %v454_v43 = vmul.f32 %v4319_v39, %v453_v34  ;;  %vm4469_vm13 = vmor %vm475_vm6, %vm476_vm10  ;;  %v3732_v34 = vld [vmem:[%s5324_s2 + $0x8] sm:$0xff] }
  0xad   : > { %v540_v41 = vpack.c.bf16 %v532_v32, %v532_v32  ;;  %v472_v42 = vmul.f32 0.5, %v471_v33  ;;  %v4454_v52 = vmul.f32 %v369_v45, %v4249_v38  ;;  %vm515_vm12 = vweird.f32 %v4375_v5  ;;  %v3749_v33 = vld [vmem:[%s5324_s2 + $0x90] sm:$0xff]  ;;  %1144 = vmatpush.bf16.msra.mxu1 %v3743_v30  ;;  %1118 = vmatpush.bf16.msra.mxu0 %v3732_v34 }
  0xae   : > { %v355_v47 = vor.u32 %v353_v26, %v352_v36  ;;  %v356_v9 = vrot.slane %v352_v36, 4  ;;  %v538_v48 = vpack.c.bf16 %v530_v37, %v530_v37  ;;  %v493_v49 = vsub.f32 1.5, %v492_v8  ;;  %1338 = vmatpush.bf16.msra.mxu2 %v3749_v33  ;;  %v629_v33 = vld [vmem:[#allocation2 + $0xc] sm:$0x1] }
  0xaf   : > { %v570_v54 = vshrl.u32 %v540_v41, 16  ;;  %v573_v44 = vshll.u32 %v540_v41, 16  ;;  %v473_v55 = vsub.f32 1.5, %v472_v42  ;;  %v458_v56 = vsel %vm4425_vm3, %v4319_v39, %v454_v43  ;;  %v644_v39 = vld [vmem:[#allocation2 + $0x20] sm:$0xf]  ;;  %v4463_v22 = vpop.eup %4026 }
  0xb0   : > { %v362_v59 = vsel %vm4410_vm9, %v355_v47, %v361_v28  ;;  %v365_v61 = vsel %vm4183_vm2, %v356_v9, %v364_v40  ;;  %v554_v63 = vshrl.u32 %v538_v48, 16  ;;  %v494_v13 = vmul.f32 %v4353_v60, %v493_v49  ;;  %v320_v41 = vld [vmem:[#allocation2 + $0x4c] sm:$0x1]  ;;  %v3759_v42 = vld [vmem:[%s5324_s2 + $0xe0] sm:$0xff]  ;;  %v3742_v47 = vld [vmem:[%s5324_s2 + $0x58] sm:$0xff] }
  0xb1   : > { %363 = vst [vmem:[#allocation2] sm:$0xf] %v362_v59  ;;  %v572_v4 = vrot.slane %v570_v54, 7  ;;  %v474_v16 = vmul.f32 %v4370_v1, %v473_v55  ;;  %v529_v17 = vmul.f32 %v458_v56, %v4217_v12  ;;  %v557_v27 = vshll.u32 %v538_v48, 16  ;;  %1365 = vmatpush.bf16.msra.mxu3 %v3759_v42  ;;  %1145 = vmatpush.bf16.msra.mxu1 %v3742_v47 }
  0xb2   : > { %366 = vst [vmem:[#allocation2 + $0x4] sm:$0x1] %v365_v61  ;;  %v556_v26 = vrot.slane %v554_v63, 7  ;;  %4028 = vrsqrt.f32 %v4365_v62  ;;  %v289_v12 = vsel %vm4183_vm2, 0, %v288_v51  ;;  %v498_v25 = vsel %vm4449_vm11, %v4353_v60, %v494_v13  ;;  %v3731_v51 = vld [vmem:[%s5324_s2] sm:$0xff]  ;;  %v3758_v63 = vld [vmem:[%s5324_s2 + $0xd8] sm:$0xff]  ;;  %1339 = vmatpush.bf16.msra.mxu2 %v3748_v50 }
  0xb3   : > { %v575_v31 = vor.u32 %v573_v44, %v572_v4  ;;  %v576_v32 = vrot.slane %v572_v4, 4  ;;  %v478_v19 = vsel %vm4469_vm13, %v4370_v1, %v474_v16  ;;  %290 = vst [vmem:[#allocation2 + $0x48] sm:$0x1] %v289_v12  ;;  %v533_v37 = vmul.f32 %v498_v25, %v4221_v14  ;;  %v641_v16 = vld [vmem:[#allocation2 + $0x1c] sm:$0x1]  ;;  %1119 = vmatpush.bf16.msra.mxu0 %v3731_v51  ;;  %v3741_v25 = vld [vmem:[%s5324_s2 + $0x50] sm:$0xff] }
  0xb4   : > { %v559_v53 = vor.u32 %v557_v27, %v556_v26  ;;  %v560_v36 = vrot.slane %v556_v26, 4  ;;  %v531_v60 = vmul.f32 %v478_v19, %v4223_v15  ;;  %v537_v28 = vpack.c.bf16 %v529_v17, %v529_v17  ;;  %v3747_v19 = vld [vmem:[%s5324_s2 + $0x80] sm:$0xff] }
  0xb5   : > { %v645_v8 = vsel %vm4410_vm9, %v575_v31, %v644_v39  ;;  %v648_v1 = vsel %vm4183_vm2, %v576_v32, %v647_v6  ;;  %v510_v40 = vmul.f32 %v4463_v22, %v4375_v5  ;;  %v541_v43 = vpack.c.bf16 %v533_v37, %v533_v37  ;;  %1366 = vmatpush.bf16.msra.mxu3 %v3758_v63  ;;  %v3757_v37 = vld [vmem:[%s5324_s2 + $0xd0] sm:$0xff] }
  0xb6   : > { %646 = vst [vmem:[#allocation2 + $0x20] sm:$0xf] %v645_v8  ;;  %v633_v14 = vsel %vm4410_vm9, %v559_v53, %v632_v10  ;;  %v636_v15 = vsel %vm4183_vm2, %v560_v36, %v635_v11  ;;  %v539_v45 = vpack.c.bf16 %v531_v60, %v531_v60  ;;  %v546_v9 = vshrl.u32 %v537_v28, 16  ;;  %v626_v10 = vld [vmem:[#allocation2 + $0x8] sm:$0xf]  ;;  %v432_v36 = vpop.xlane.xlu0 %431  ;;  %1146 = vmatpush.bf16.msra.mxu1 %v3741_v25  ;;  %v3778_v25 = vld [vmem:[%s5324_s2 + $0x178] sm:$0xff] }
  0xb7   : > { %649 = vst [vmem:[#allocation2 + $0x24] sm:$0x1] %v648_v1  ;;  %v549_v48 = vshll.u32 %v537_v28, 16  ;;  %v511_v49 = vmul.f32 %v4463_v22, %v510_v40  ;;  %vm505_vm14 = vweird.f32 %v4365_v62  ;;  %v578_v44 = vshrl.u32 %v541_v43, 16  ;;  %v317_v28 = vld [vmem:[#allocation2 + $0x44] sm:$0x1]  ;;  %1340 = vmatpush.bf16.msra.mxu2 %v3747_v19 }
  0xb8   : > { %v4517_v54 = vpop.eup %4028  ;;  %634 = vst [vmem:[#allocation2 + $0x10] sm:$0xf] %v633_v14  ;;  %v581_v55 = vshll.u32 %v541_v43, 16  ;;  %v562_v56 = vshrl.u32 %v539_v45, 16  ;;  %vm516_vm15 = vweird.f32 %v4463_v22  ;;  %v565_v59 = vshll.u32 %v539_v45, 16 }
  0xb9   : > { %637 = vst [vmem:[#allocation2 + $0x14] sm:$0x1] %v636_v15  ;;  %v548_v61 = vrot.slane %v546_v9, 7  ;;  %v512_v39 = vmul.f32 0.5, %v511_v49  ;;  %v500_v6 = vmul.f32 %v4517_v54, %v4365_v62  ;;  %v580_v2 = vrot.slane %v578_v44, 7  ;;  %vm4534_vm0 = vmor %vm515_vm12, %vm516_vm15  ;;  %v3740_v15 = vld [vmem:[%s5324_s2 + $0x48] sm:$0xff]  ;;  %1367 = vmatpush.bf16.msra.mxu3 %v3757_v37 }
  0xba   : > { %v564_v4 = vrot.slane %v562_v56, 7  ;;  %v321_v11 = vsel %vm4190_vm4, 0, %v320_v41  ;;  %v286_v13 = vsel %vm4183_vm2, 0, %v285_v46  ;;  %vm506_vm1 = vweird.f32 %v4517_v54  ;;  %v674_v46 = vld [vmem:[#allocation2] sm:$0xf]  ;;  %v3756_v62 = vld [vmem:[%s5324_s2 + $0xc8] sm:$0xff]  ;;  %1147 = vmatpush.bf16.msra.mxu1 %v3740_v15 }
  0xbb   : > { %v551_v17 = vor.u32 %v549_v48, %v548_v61  ;;  %v552_v23 = vrot.slane %v548_v61, 4  ;;  %v513_v26 = vsub.f32 1.5, %v512_v39  ;;  %v501_v27 = vmul.f32 %v4517_v54, %v500_v6  ;;  %322 = vst [vmem:[#allocation2 + $0x4c] sm:$0x1] %v321_v11  ;;  %vm4575_vm5 = vmor %vm505_vm14, %vm506_vm1  ;;  %v4589_v49 = vld [vmem:[#allocation2 + $0x4] sm:$0x1] }
  0xbc   : > { %v583_v29 = vor.u32 %v581_v55, %v580_v2  ;;  %v584_v12 = vrot.slane %v580_v2, 4  ;;  %v567_v30 = vor.u32 %v565_v59, %v564_v4  ;;  %v568_v31 = vrot.slane %v564_v4, 4  ;;  %287 = vst [vmem:[#allocation2 + $0x40] sm:$0x1] %v286_v13  ;;  %v2942_v50 = vld [vmem:[#allocation2] sm:$0xf] }
  0xbd   : > { %v627_v34 = vsel %vm4410_vm9, %v551_v17, %v626_v10  ;;  %v514_v5 = vmul.f32 %v4463_v22, %v513_v26  ;;  %v502_v53 = vmul.f32 0.5, %v501_v27  ;;  %v4563_v14 = vadd.f32 1e-05, %v4454_v52  ;;  %1368 = vmatpush.bf16.msra.mxu3 %v3756_v62  ;;  %v3794_v26 = vld [vmem:[%s5324_s2 + $0x1f8] sm:$0xff]  ;;  %v3769_v62 = vld [vmem:[%s5324_s2 + $0x130] sm:$0xff] }
  0xbe   : > { %v651_v60 = vsel %vm4410_vm9, %v583_v29, %v650_v57  ;;  %v654_v8 = vsel %vm4183_vm2, %v584_v12, %v653_v7  ;;  %v639_v1 = vsel %vm4410_vm9, %v567_v30, %v638_v58  ;;  %628 = vst [vmem:[#allocation2 + $0x8] sm:$0xf] %v627_v34  ;;  %v642_v40 = vsel %vm4183_vm2, %v568_v31, %v641_v16  ;;  %v3786_v57 = vld [vmem:[%s5324_s2 + $0x1b8] sm:$0xff] }
  0xbf   : > { %652 = vst [vmem:[#allocation2 + $0x28] sm:$0xf] %v651_v60  ;;  %v518_v41 = vsel %vm4534_vm0, %v4463_v22, %v514_v5  ;;  %v503_v42 = vsub.f32 1.5, %v502_v53  ;;  %v630_v43 = vsel %vm4183_vm2, %v552_v23, %v629_v33  ;;  %v440_v52 = vmul.f32 %v432_v36, %v4249_v38  ;;  %v662_v7 = vld [vmem:[#allocation2 + $0x38] sm:$0xf]  ;;  %1752 = vmatpush.bf16.msrb.mxu2 %v3786_v57  ;;  %v3785_v53 = vld [vmem:[%s5324_s2 + $0x1b0] sm:$0xff] }
  0xc0   : > { %655 = vst [vmem:[#allocation2 + $0x2c] sm:$0x1] %v654_v8  ;;  %v535_v45 = vmul.f32 %v518_v41, %v4233_v20  ;;  %4030 = vrsqrt.f32 %v4563_v14  ;;  %v318_v20 = vsel %vm4190_vm4, 0, %v317_v28  ;;  %vm694_vm6 = vsmask.f32 3328  ;;  %1148 = vmatpush.bf16.msra.mxu1 %v3739_v3  ;;  %v3770_v27 = vld [vmem:[%s5324_s2 + $0x138] sm:$0xff] }
  0xc1   : > { %640 = vst [vmem:[#allocation2 + $0x18] sm:$0xf] %v639_v1  ;;  %v504_v47 = vmul.f32 %v4517_v54, %v503_v42  ;;  %v4587_v48 = vadd.f32 1e-05, %v440_v52  ;;  %vm695_vm4 = vsmask.f32 7440  ;;  %vm378_vm7 = vweird.f32 %v4563_v14  ;;  %1544 = vmatpush.bf16.msrb.mxu0 %v3770_v27 }
  0xc2   : > { %643 = vst [vmem:[#allocation2 + $0x1c] sm:$0x1] %v642_v40  ;;  %v543_v9 = vpack.c.bf16 %v535_v45, %v535_v45  ;;  %v698_v51 = vshrl.u32 %v674_v46, 16  ;;  %v665_v58 = vld [vmem:[#allocation2 + $0x3c] sm:$0x1]  ;;  %v707_v16 = vshll.u32 %v4589_v49, 16  ;;  %vm4648_vm11 = vmor %vm694_vm6, %vm695_vm4 }
  0xc3   : > { %631 = vst [vmem:[#allocation2 + $0xc] sm:$0x1] %v630_v43  ;;  %v508_v38 = vsel %vm4575_vm5, %v4517_v54, %v504_v47  ;;  %4032 = vrsqrt.f32 %v4587_v48  ;;  %v3755_v54 = vld [vmem:[%s5324_s2 + $0xc0] sm:$0xff]  ;;  %v2946_v2 = vld [vmem:[#allocation2 + $0x10] sm:$0xf]  ;;  %vm525_vm10 = vweird.f32 %v4587_v48  ;;  %1753 = vmatpush.bf16.msrb.mxu2 %v3785_v53 }
  0xc4   : > { %v594_v44 = vshrl.u32 %v543_v9, 16  ;;  %v597_v55 = vshll.u32 %v543_v9, 16  ;;  %v534_v56 = vmul.f32 %v508_v38, %v4229_v18  ;;  %319 = vst [vmem:[#allocation2 + $0x44] sm:$0x1] %v318_v20  ;;  %v701_v18 = vshll.u32 %v674_v46, 16  ;;  %1369 = vmatpush.bf16.msra.mxu3 %v3755_v54  ;;  %1573 = vmatpush.bf16.msrb.mxu1 %v3778_v25  ;;  %v3793_v22 = vld [vmem:[%s5324_s2 + $0x1f0] sm:$0xff] }
  0xc5   : > { %v3726_v59 = vld [vmem:[#allocation2 + $0x4] sm:$0xf0]  ;;  %v700_v4 = vrot.slane %v698_v51, 4  ;;  %v4608_v10 = vld [vmem:[#allocation2 + $0x10] sm:$0xf]  ;;  %v709_v20 = vrot.slane %v707_v16, 5  ;;  %1545 = vmatpush.bf16.msrb.mxu0 %v3769_v62 }
  0xc6   : > { %v4606_v61 = vld [vmem:[#allocation2 + $0x8] sm:$0xf]  ;;  %v596_v39 = vrot.slane %v594_v44, 7  ;;  %v542_v6 = vpack.c.bf16 %v534_v56, %v534_v56  ;;  %v2943_v63 = vor.u32 %v3726_v59, %v2942_v50  ;;  %v4610_v11 = vpop.eup %4030  ;;  %v703_v13 = vrot.slane %v701_v18, 5  ;;  %v656_v8 = vld [vmem:[#allocation2 + $0x30] sm:$0xf] }
  0xc7   : > { %v712_v17 = vshrl.u32 %v4606_v61, 16  ;;  %v715_v23 = vshll.u32 %v4606_v61, 16  ;;  %v373_v19 = vmul.f32 %v4610_v11, %v4563_v14  ;;  %v726_v5 = vshrl.u32 %v4608_v10, 16  ;;  %v659_v1 = vld [vmem:[#allocation2 + $0x34] sm:$0x1] }
  0xc8   : > { %v599_v29 = vor.u32 %v597_v55, %v596_v39  ;;  %v600_v12 = vrot.slane %v596_v39, 4  ;;  %v586_v30 = vshrl.u32 %v542_v6, 16  ;;  %v589_v31 = vshll.u32 %v542_v6, 16  ;;  %1120 = vmatmul.bf16.vlgmr.msra.gmra.mxu0 %v2943_v63  ;;  %v3727_v32 = vld [vmem:[#allocation2 + $0x14] sm:$0xf0]  ;;  %1781 = vmatpush.bf16.msrb.mxu3 %v3794_v26  ;;  %v3777_v44 = vld [vmem:[%s5324_s2 + $0x170] sm:$0xff] }
  0xc9   : > { %v1211_v33 = vrot.slane %v2943_v63, 4  ;;  %v4627_v34 = vor.u32 %v3727_v32, %v2946_v2  ;;  %v4633_v36 = vpop.eup %4032  ;;  %v704_v40 = vor.u32 %v703_v13, %v700_v4  ;;  %v374_v41 = vmul.f32 %v4610_v11, %v373_v19  ;;  %v4664_v51 = vld [vmem:[#allocation2 + $0x14] sm:$0x1]  ;;  %1574 = vmatpush.bf16.msrb.mxu1 %v3777_v44  ;;  %v2950_v19 = vld [vmem:[#allocation2 + $0x20] sm:$0xf] }
  0xca   : > { %v663_v37 = vsel %vm4410_vm9, %v599_v29, %v662_v7  ;;  %v666_v60 = vsel %vm4183_vm2, %v600_v12, %v665_v58  ;;  %v588_v28 = vrot.slane %v586_v30, 7  ;;  %vm379_vm3 = vweird.f32 %v4610_v11  ;;  %v4644_v43 = vld [vmem:[#allocation2 + $0xc] sm:$0x1]  ;;  %v677_v7 = vld [vmem:[#allocation2 + $0x18] sm:$0xf]  ;;  %v3817_v45 = vld [vmem:[%s5324_s2 + $0x2b0] sm:$0xff] }
  0xcb   : > { %664 = vst [vmem:[#allocation2 + $0x38] sm:$0xf] %v663_v37  ;;  %v520_v42 = vmul.f32 %v4633_v36, %v4587_v48  ;;  %v1212_v15 = vrot.slane %v4627_v34, 4  ;;  %v705_v47 = vrot.slane %v704_v40, 4  ;;  %v375_v9 = vmul.f32 0.5, %v374_v41  ;;  %vm4682_vm13 = vmor %vm378_vm7, %vm379_vm3  ;;  %v3776_v41 = vld [vmem:[%s5324_s2 + $0x168] sm:$0xff] }
  0xcc   : > { %667 = vst [vmem:[#allocation2 + $0x3c] sm:$0x1] %v666_v60  ;;  %v591_v52 = vor.u32 %v589_v31, %v588_v28  ;;  %v592_v46 = vrot.slane %v588_v28, 4  ;;  %v714_v3 = vrot.slane %v712_v17, 4  ;;  %1782 = vmatpush.bf16.msrb.mxu3 %v3793_v22  ;;  %v717_v57 = vrot.slane %v715_v23, 5  ;;  %v3784_v60 = vld [vmem:[%s5324_s2 + $0x1a8] sm:$0xff] }
  0xcd   : > { %v521_v38 = vmul.f32 %v4633_v36, %v520_v42  ;;  %v4662_v50 = vsel %vm359_vm8, %v1211_v33, %v1212_v15  ;;  %v710_v54 = vsel %vm4648_vm11, %v705_v47, %v709_v20  ;;  %v376_v58 = vsub.f32 1.5, %v375_v9  ;;  %v4689_v17 = vld [vmem:[#allocation2 + $0x1c] sm:$0x1]  ;;  %v678_v33 = vld [vmem:[#allocation2 + $0x20] sm:$0xf]  ;;  %1754 = vmatpush.bf16.msrb.mxu2 %v3784_v60  ;;  %1575 = vmatpush.bf16.msrb.mxu1 %v3776_v41 }
  0xce   : > { %v657_v55 = vsel %vm4410_vm9, %v591_v52, %v656_v8  ;;  %v660_v56 = vsel %vm4183_vm2, %v592_v46, %v659_v1  ;;  %1341 = vmatmul.bf16.vlgmr.msra.gmra.mxu2 %v4662_v50  ;;  %vm526_vm12 = vweird.f32 %v4633_v36  ;;  %v721_v61 = vshll.u32 %v4644_v43, 16  ;;  %v3768_v8 = vld [vmem:[%s5324_s2 + $0x128] sm:$0xff]  ;;  %v3791_v47 = vld [vmem:[%s5324_s2 + $0x1e0] sm:$0xff] }
  0xcf   : > { %658 = vst [vmem:[#allocation2 + $0x30] sm:$0xf] %v657_v55  ;;  %v522_v59 = vmul.f32 0.5, %v521_v38  ;;  %v718_v39 = vor.u32 %v717_v57, %v714_v3  ;;  %v728_v6 = vrot.slane %v726_v5, 4  ;;  %v729_v63 = vshll.u32 %v4608_v10, 16  ;;  %vm4693_vm14 = vmor %vm525_vm10, %vm526_vm12  ;;  %1546 = vmatpush.bf16.msrb.mxu0 %v3768_v8  ;;  %v3775_v3 = vld [vmem:[%s5324_s2 + $0x160] sm:$0xff] }
  0xd0   : > { %661 = vst [vmem:[#allocation2 + $0x34] sm:$0x1] %v660_v56  ;;  %v735_v2 = vshll.u32 %v4664_v51, 16  ;;  %v377_v4 = vmul.f32 %v4610_v11, %v376_v58  ;;  %v940_v16 = vunpack.c.l.b16 %v710_v54  ;;  %v740_v23 = vshrl.u32 %v677_v7, 16  ;;  %v3728_v10 = vld [vmem:[#allocation2 + $0x24] sm:$0xf0] }
  0xd1   : > { %v523_v13 = vsub.f32 1.5, %v522_v59  ;;  %v719_v26 = vrot.slane %v718_v39, 4  ;;  %v723_v27 = vrot.slane %v721_v61, 5  ;;  %v731_v29 = vrot.slane %v729_v63, 5  ;;  %v679_v57 = vld [vmem:[#allocation2 + $0x28] sm:$0xf]  ;;  %1576 = vmatpush.bf16.msrb.mxu1 %v3775_v3 }
  0xd2   : > { %v743_v12 = vshll.u32 %v677_v7, 16  ;;  %v381_v30 = vsel %vm4682_vm13, %v4610_v11, %v377_v4  ;;  %v737_v32 = vrot.slane %v735_v2, 5  ;;  %v742_v25 = vrot.slane %v740_v23, 4  ;;  %v3792_v11 = vld [vmem:[%s5324_s2 + $0x1e8] sm:$0xff]  ;;  %v4742_v63 = vld [vmem:[#allocation2 + $0x24] sm:$0x1] }
  0xd3   : > { %v524_v31 = vmul.f32 %v4633_v36, %v523_v13  ;;  %v382_v48 = vmul.f32 %v381_v30, %v4235_v21  ;;  %v724_v5 = vsel %vm4648_vm11, %v719_v26, %v723_v27  ;;  %v732_v53 = vor.u32 %v731_v29, %v728_v6  ;;  %1783 = vmatpush.bf16.msrb.mxu3 %v3792_v11  ;;  %v395_v7 = vld [vmem:[#allocation2 + $0x48] sm:$0xf]  ;;  %v398_v4 = vld [vmem:[#allocation2 + $0x4c] sm:$0x1]  ;;  %v668_v13 = vld [vmem:[#allocation2 + $0x40] sm:$0xf] }
  0xd4   : > { %v745_v37 = vrot.slane %v743_v12, 5  ;;  %v941_v1 = vunpack.c.l.b16 %v724_v5  ;;  %v749_v28 = vshll.u32 %v4689_v17, 16  ;;  %v4717_v40 = vor.u32 %v3728_v10, %v2950_v19  ;;  %v671_v12 = vld [vmem:[#allocation2 + $0x44] sm:$0x1] }
  0xd5   : > { %v528_v21 = vsel %vm4693_vm14, %v4633_v36, %v524_v31  ;;  %v383_v42 = vpack.c.bf16 %v382_v48, %v382_v48  ;;  %v733_v52 = vrot.slane %v732_v53, 4  ;;  %v3783_v36 = vld [vmem:[%s5324_s2 + $0x1a0] sm:$0xff]  ;;  %v754_v9 = vshrl.u32 %v678_v33, 16  ;;  %v4753_v31 = vld [vmem:[#allocation2 + $0x2c] sm:$0x1] }
  0xd6   : > { %v536_v22 = vmul.f32 %v528_v21, %v4241_v24  ;;  %v746_v46 = vor.u32 %v745_v37, %v742_v25  ;;  %v4729_v20 = vpack.c.b16 %v941_v1, %v940_v16  ;;  %v1217_v62 = vrot.slane %v4717_v40, 4  ;;  %v3767_v24 = vld [vmem:[%s5324_s2 + $0x120] sm:$0xff]  ;;  %1755 = vmatpush.bf16.msrb.mxu2 %v3783_v36  ;;  %v680_v48 = vld [vmem:[#allocation2 + $0x30] sm:$0xf]  ;;  %v3729_v1 = vld [vmem:[#allocation2 + $0x34] sm:$0xf0] }
  0xd7   : > { %v757_v38 = vshll.u32 %v678_v33, 16  ;;  %v385_v44 = vshrl.u32 %v383_v42, 16  ;;  %v388_v55 = vshll.u32 %v383_v42, 16  ;;  %v738_v54 = vsel %vm4648_vm11, %v733_v52, %v737_v32  ;;  %1784 = vmatpush.bf16.msrb.mxu3 %v3791_v47  ;;  %1547 = vmatpush.bf16.msrb.mxu0 %v3767_v24  ;;  %v2954_v47 = vld [vmem:[#allocation2 + $0x30] sm:$0xf] }
  0xd8   : > { %v544_v56 = vpack.c.bf16 %v536_v22, %v536_v22  ;;  %1125 = vmatmul.bf16.gmra.mxu0 %v4627_v34  ;;  %1149 = vmatmul.bf16.vlgmr.msra.gmra.mxu1 %v4729_v20  ;;  %v747_v58 = vrot.slane %v746_v46, 4  ;;  %v751_v59 = vrot.slane %v749_v28, 5  ;;  %v942_v61 = vunpack.c.l.b16 %v738_v54  ;;  %v681_v22 = vld [vmem:[#allocation2 + $0x38] sm:$0xf] }
  0xd9   : > { %v387_v18 = vrot.slane %v385_v44, 7  ;;  %v756_v2 = vrot.slane %v754_v9, 4  ;;  %v4751_v23 = vsel %vm359_vm8, %v1212_v15, %v1217_v62  ;;  %v759_v14 = vrot.slane %v757_v38, 5  ;;  %v4775_v44 = vld [vmem:[#allocation2 + $0x34] sm:$0x1] }
  0xda   : > { %v602_v39 = vshrl.u32 %v544_v56, 16  ;;  %v605_v6 = vshll.u32 %v544_v56, 16  ;;  %v752_v16 = vsel %vm4648_vm11, %v747_v58, %v751_v59  ;;  %v768_v26 = vshrl.u32 %v679_v57, 16  ;;  %v3782_v58 = vld [vmem:[%s5324_s2 + $0x198] sm:$0xff] }
  0xdb   : > { %v390_v27 = vor.u32 %v388_v55, %v387_v18  ;;  %v391_v29 = vrot.slane %v387_v18, 4  ;;  %v943_v30 = vunpack.c.l.b16 %v752_v16  ;;  %v760_v32 = vor.u32 %v759_v14, %v756_v2  ;;  %v3790_v59 = vld [vmem:[%s5324_s2 + $0x1d8] sm:$0xff]  ;;  %1756 = vmatpush.bf16.msrb.mxu2 %v3782_v58  ;;  %v3781_v14 = vld [vmem:[%s5324_s2 + $0x190] sm:$0xff] }
  0xdc   : > { %v604_v10 = vrot.slane %v602_v39, 7  ;;  %v763_v25 = vshll.u32 %v4742_v63, 16  ;;  %v770_v19 = vrot.slane %v768_v26, 4  ;;  %v771_v33 = vshll.u32 %v679_v57, 16  ;;  %1785 = vmatpush.bf16.msrb.mxu3 %v3790_v59  ;;  %v3789_v26 = vld [vmem:[%s5324_s2 + $0x1d0] sm:$0xff] }
  0xdd   : > { %v396_v15 = vsel %vm4410_vm9, %v390_v27, %v395_v7  ;;  %v399_v5 = vsel %vm4183_vm2, %v391_v29, %v398_v4  ;;  %v4761_v60 = vpack.c.b16 %v943_v30, %v942_v61  ;;  %v1214_v11 = vrot.slane %v4729_v20, 4  ;;  %v3766_v61 = vld [vmem:[%s5324_s2 + $0x118] sm:$0xff] }
  0xde   : > { %v607_v53 = vor.u32 %v605_v6, %v604_v10  ;;  %v608_v37 = vrot.slane %v604_v10, 4  ;;  %1346 = vmatmul.bf16.gmra.mxu2 %v4751_v23  ;;  %397 = vst [vmem:[#allocation2 + $0x48] sm:$0xf] %v396_v15  ;;  %v773_v8 = vrot.slane %v771_v33, 5  ;;  %v777_v21 = vshll.u32 %v4753_v31, 16  ;;  %v3774_v6 = vld [vmem:[%s5324_s2 + $0x158] sm:$0xff]  ;;  %1548 = vmatpush.bf16.msrb.mxu0 %v3766_v61 }
  0xdf   : > { %400 = vst [vmem:[#allocation2 + $0x4c] sm:$0x1] %v399_v5  ;;  %v761_v42 = vrot.slane %v760_v32, 4  ;;  %v782_v52 = vshrl.u32 %v680_v48, 16  ;;  %v1215_v46 = vrot.slane %v4761_v60, 4  ;;  %v765_v9 = vrot.slane %v763_v25, 5  ;;  %1577 = vmatpush.bf16.msrb.mxu1 %v3774_v6  ;;  %1757 = vmatpush.bf16.msrb.mxu2 %v3781_v14 }
  0xe0   : > { %v669_v28 = vsel %vm4410_vm9, %v607_v53, %v668_v13  ;;  %v672_v41 = vsel %vm4183_vm2, %v608_v37, %v671_v12  ;;  %v774_v36 = vor.u32 %v773_v8, %v770_v19  ;;  %v785_v24 = vshll.u32 %v680_v48, 16  ;;  %v4803_v29 = vld [vmem:[#allocation2 + $0x3c] sm:$0x1]  ;;  %v3765_v12 = vld [vmem:[%s5324_s2 + $0x110] sm:$0xff]  ;;  %v837_v15 = vld [vmem:[#allocation2] sm:$0xe]  ;;  %1786 = vmatpush.bf16.msrb.mxu3 %v3789_v26 }
  0xe1   : > { %670 = vst [vmem:[#allocation2 + $0x40] sm:$0xf] %v669_v28  ;;  %v784_v38 = vrot.slane %v782_v52, 4  ;;  %v4773_v35 = vsel %vm359_vm8, %v1214_v11, %v1215_v46  ;;  %v779_v0 = vrot.slane %v777_v21, 5  ;;  %v796_v55 = vshrl.u32 %v681_v22, 16  ;;  %v3773_v10 = vld [vmem:[%s5324_s2 + $0x150] sm:$0xff] }
  0xe2   : > { %673 = vst [vmem:[#allocation2 + $0x44] sm:$0x1] %v672_v41  ;;  %v775_v3 = vrot.slane %v774_v36, 4  ;;  %1370 = vmatmul.bf16.vlgmr.msra.gmra.mxu3 %v4773_v35  ;;  %v766_v56 = vsel %vm4648_vm11, %v761_v42, %v765_v9  ;;  %v4780_v54 = vor.u32 %v3729_v1, %v2954_v47  ;;  %v787_v57 = vrot.slane %v785_v24, 5  ;;  %1549 = vmatpush.bf16.msrb.mxu0 %v3765_v12  ;;  %v3764_v11 = vld [vmem:[%s5324_s2 + $0x108] sm:$0xff] }
  0xe3   : > { %v799_v7 = vshll.u32 %v681_v22, 16  ;;  %v791_v39 = vshll.u32 %v4775_v44, 16  ;;  %v798_v13 = vrot.slane %v796_v55, 4  ;;  %v944_v27 = vunpack.c.l.b16 %v766_v56  ;;  %1578 = vmatpush.bf16.msrb.mxu1 %v3773_v10  ;;  %v3780_v8 = vld [vmem:[%s5324_s2 + $0x188] sm:$0xff]  ;;  %v839_v9 = vld [vmem:[#allocation2 + $0x10] sm:$0xe] }
  0xe4   : > { %v780_v18 = vsel %vm4648_vm11, %v775_v3, %v779_v0  ;;  %v788_v4 = vor.u32 %v787_v57, %v784_v38  ;;  %v1221_v30 = vrot.slane %v4780_v54, 4  ;;  %v805_v32 = vshll.u32 %v4803_v29, 16  ;;  %v838_v21 = vld [vmem:[#allocation2 + $0x8] sm:$0xe]  ;;  %1758 = vmatpush.bf16.msrb.mxu2 %v3780_v8  ;;  %v3763_v0 = vld [vmem:[%s5324_s2 + $0x100] sm:$0xff] }
  0xe5   : > { %v945_v2 = vunpack.c.l.b16 %v780_v18  ;;  %v801_v16 = vrot.slane %v799_v7, 5  ;;  %v793_v33 = vrot.slane %v791_v39, 5  ;;  %v3730_v48 = vld [vmem:[#allocation2 + $0x44] sm:$0xf0]  ;;  %vm867_vm2 = vcmask 1042432  }
  0xe6   : > { %v789_v19 = vrot.slane %v788_v4, 4  ;;  %vm868_vm9 = vcmask 1046532   ;;  %v4828_v1 = vsel %vm359_vm8, %v1217_v62, %v1221_v30  ;;  %v807_v28 = vrot.slane %v805_v32, 5  ;;  %v683_v41 = vld [vmem:[#allocation2 + $0x48] sm:$0xf]  ;;  %1550 = vmatpush.bf16.msrb.mxu0 %v3764_v11 }
  0xe7   : > { %v4815_v25 = vpack.c.b16 %v945_v2, %v944_v27  ;;  %v802_v5 = vor.u32 %v801_v16, %v798_v13  ;;  %vm4835_vm15 = vmor %vm867_vm2, %vm868_vm9  ;;  %v2930_v62 = vrot.slane %v837_v15, 9  ;;  %v872_v24 = vrot.slane %v4589_v49, 5  ;;  %v840_v58 = vld [vmem:[#allocation2 + $0x18] sm:$0xe]  ;;  %v841_v2 = vld [vmem:[#allocation2 + $0x20] sm:$0xe] }
  0xe8   : > { %1130 = vmatmul.bf16.gmra.mxu0 %v4717_v40  ;;  %1154 = vmatmul.bf16.gmra.mxu1 %v4761_v60  ;;  %v2958_v53 = vld [vmem:[#allocation2 + $0x40] sm:$0xf]  ;;  %v794_v22 = vsel %vm4648_vm11, %v789_v19, %v793_v33  ;;  %v2931_v3 = vrot.slane %v838_v21, 9  ;;  %v824_v55 = vshrl.u32 %v683_v41, 16  ;;  %v876_v56 = vrot.slane %v4644_v43, 5  ;;  %v3772_v33 = vld [vmem:[%s5324_s2 + $0x148] sm:$0xff] }
  0xe9   : > { %v682_v37 = vld [vmem:[#allocation2 + $0x40] sm:$0xf]  ;;  %v1219_v42 = vrot.slane %v4815_v25, 4  ;;  %v4833_v52 = vor.u32 %v3730_v48, %v2958_v53  ;;  %v803_v38 = vrot.slane %v802_v5, 4  ;;  %v873_v7 = vsel %vm4835_vm15, %v2930_v62, %v872_v24  ;;  %v842_v16 = vld [vmem:[#allocation2 + $0x28] sm:$0xe]  ;;  %1579 = vmatpush.bf16.msrb.mxu1 %v3772_v33 }
  0xea   : > { %v810_v36 = vshrl.u32 %v682_v37, 16  ;;  %v813_v57 = vshll.u32 %v682_v37, 16  ;;  %v2932_v59 = vrot.slane %v839_v9, 9  ;;  %v880_v61 = vrot.slane %v4664_v51, 5  ;;  %1551 = vmatpush.bf16.msrb.mxu0 %v3763_v0  ;;  %v843_v10 = vld [vmem:[#allocation2 + $0x30] sm:$0xe] }
  0xeb   : > { %v946_v18 = vunpack.c.l.b16 %v794_v22  ;;  %v1225_v49 = vrot.slane %v4833_v52, 4  ;;  %v877_v6 = vsel %vm4835_vm15, %v2931_v3, %v876_v56  ;;  %v4858_v43 = vsel %vm359_vm8, %v1215_v46, %v1219_v42  ;;  %v3788_v46 = vld [vmem:[%s5324_s2 + $0x1c8] sm:$0xff]  ;;  %v3779_v19 = vld [vmem:[%s5324_s2 + $0x180] sm:$0xff]  ;;  %v844_v8 = vld [vmem:[#allocation2 + $0x38] sm:$0xe] }
  0xec   : > { %v4849_v39 = vrot.slane %v810_v36, 4  ;;  %v808_v4 = vsel %vm4648_vm11, %v803_v38, %v807_v28  ;;  %v960_v51 = vunpack.c.l.b16 %v873_v7  ;;  %v961_v13 = vunpack.c.l.b16 %v877_v6  ;;  %v692_v28 = vld [vmem:[#allocation2 + $0x44] sm:$0x1]  ;;  %1787 = vmatpush.bf16.msrb.mxu3 %v3788_v46  ;;  %1759 = vmatpush.bf16.msrb.mxu2 %v3779_v19  ;;  %v845_v9 = vld [vmem:[#allocation2 + $0x40] sm:$0xe] }
  0xed   : > { %v827_v14 = vshll.u32 %v683_v41, 16  ;;  %v881_v26 = vsel %vm4835_vm15, %v2932_v59, %v880_v61  ;;  %v2933_v27 = vrot.slane %v840_v58, 9  ;;  %v884_v12 = vrot.slane %v4689_v17, 5  ;;  %v3787_v41 = vld [vmem:[%s5324_s2 + $0x1c0] sm:$0xff]  ;;  %v693_v0 = vld [vmem:[#allocation2 + $0x4c] sm:$0x1] }
  0xee   : > { %1351 = vmatmul.bf16.gmra.mxu2 %v4828_v1  ;;  %v815_v32 = vrot.slane %v813_v57, 5  ;;  %v4875_v48 = vpack.c.b16 %v961_v13, %v960_v51  ;;  %v2934_v15 = vrot.slane %v841_v2, 9  ;;  %v888_v17 = vrot.slane %v4742_v63, 5  ;;  %v846_v58 = vld [vmem:[#allocation2 + $0x48] sm:$0xe] }
  0xef   : > { %v826_v5 = vrot.slane %v824_v55, 4  ;;  %v885_v53 = vsel %vm4835_vm15, %v2933_v27, %v884_v12  ;;  %v2935_v37 = vrot.slane %v842_v16, 9  ;;  %v892_v11 = vrot.slane %v4753_v31, 5  ;;  %v3771_v31 = vld [vmem:[%s5324_s2 + $0x140] sm:$0xff] }
  0xf0   : > { %v947_v21 = vunpack.c.l.b16 %v808_v4  ;;  %v962_v22 = vunpack.c.l.b16 %v881_v26  ;;  %v963_v36 = vunpack.c.l.b16 %v885_v53  ;;  %v889_v63 = vsel %vm4835_vm15, %v2934_v15, %v888_v17  ;;  %1788 = vmatpush.bf16.msrb.mxu3 %v3787_v41  ;;  %1580 = vmatpush.bf16.msrb.mxu1 %v3771_v31  ;;  %v3825_v41 = vld [vmem:[%s5324_s2 + $0x2f0] sm:$0xff] }
  0xf1   : > { %v829_v38 = vrot.slane %v827_v14, 5  ;;  %v893_v62 = vsel %vm4835_vm15, %v2935_v37, %v892_v11  ;;  %v2936_v24 = vrot.slane %v843_v10, 9  ;;  %v896_v3 = vrot.slane %v4775_v44, 5 }
  0xf2   : > { %1375 = vmatmul.bf16.gmra.mxu3 %v4858_v43  ;;  %v4893_v55 = vpack.c.b16 %v963_v36, %v962_v22  ;;  %v964_v56 = vunpack.c.l.b16 %v889_v63  ;;  %v965_v57 = vunpack.c.l.b16 %v893_v62  ;;  %v2937_v7 = vrot.slane %v844_v8, 9  ;;  %v3818_v8 = vld [vmem:[%s5324_s2 + $0x2b8] sm:$0xff]  ;;  %v3801_v63 = vld [vmem:[%s5324_s2 + $0x230] sm:$0xff] }
  0xf3   : > { %v897_v59 = vsel %vm4835_vm15, %v2936_v24, %v896_v3  ;;  %v900_v61 = vrot.slane %v4803_v29, 5  ;;  %v2938_v6 = vrot.slane %v845_v9, 9  ;;  %v904_v2 = vrot.slane %v692_v28, 5  ;;  %2159 = vmatpush.bf16.msra.mxu2 %v3818_v8  ;;  %v3809_v9 = vld [vmem:[%s5324_s2 + $0x270] sm:$0xff]  ;;  %v3824_v24 = vld [vmem:[%s5324_s2 + $0x2e8] sm:$0xff] }
  0xf4   : > { %v4899_v4 = vpack.c.b16 %v947_v21, %v946_v18  ;;  %v819_v44 = vshll.u32 %v692_v28, 16  ;;  %v4901_v51 = vpack.c.b16 %v965_v57, %v964_v56  ;;  %v966_v13 = vunpack.c.l.b16 %v897_v59  ;;  %v3826_v21 = vld [vmem:[%s5324_s2 + $0x2f8] sm:$0xff]  ;;  %v3800_v3 = vld [vmem:[%s5324_s2 + $0x228] sm:$0xff]  ;;  %v3815_v56 = vld [vmem:[%s5324_s2 + $0x2a0] sm:$0xff] }
  0xf5   : > { %v901_v16 = vsel %vm4835_vm15, %v2937_v7, %v900_v61  ;;  %v905_v14 = vsel %vm4835_vm15, %v2938_v6, %v904_v2  ;;  %v2939_v26 = vrot.slane %v846_v58, 9  ;;  %v908_v27 = vrot.slane %v693_v0, 5  ;;  %v3810_v28 = vld [vmem:[%s5324_s2 + $0x278] sm:$0xff]  ;;  %2188 = vmatpush.bf16.msra.mxu3 %v3826_v21  ;;  %v3823_v57 = vld [vmem:[%s5324_s2 + $0x2e0] sm:$0xff] }
  0xf6   : > { %v816_v29 = vor.u32 %v815_v32, %v4849_v39  ;;  %v830_v12 = vor.u32 %v829_v38, %v826_v5  ;;  %v833_v10 = vshll.u32 %v693_v0, 16  ;;  %v967_v18 = vunpack.c.l.b16 %v901_v16  ;;  %1993 = vmatpush.bf16.msra.mxu1 %v3810_v28  ;;  %v3808_v0 = vld [vmem:[%s5324_s2 + $0x268] sm:$0xff]  ;;  %v3799_v7 = vld [vmem:[%s5324_s2 + $0x220] sm:$0xff]  ;;  %v3814_v2 = vld [vmem:[%s5324_s2 + $0x298] sm:$0xff] }
  0xf7   : > { %v4913_v46 = vsel %vm359_vm8, %v1221_v30, %v1225_v49  ;;  %v909_v19 = vsel %vm4835_vm15, %v2939_v26, %v908_v27  ;;  %v968_v33 = vunpack.c.l.b16 %v905_v14  ;;  %v1223_v39 = vrot.slane %v4899_v4, 4  ;;  %2160 = vmatpush.bf16.msra.mxu2 %v3817_v45  ;;  %v3807_v58 = vld [vmem:[%s5324_s2 + $0x260] sm:$0xff]  ;;  %v3813_v16 = vld [vmem:[%s5324_s2 + $0x290] sm:$0xff]  ;;  %v3834_v21 = vld [vmem:[%s5324_s2 + $0x338] sm:$0xff] }
  0xf8   : > { %1135 = vmatmul.bf16.gmra.mxu0 %v4780_v54  ;;  %1159 = vmatmul.bf16.gmra.mxu1 %v4815_v25  ;;  %v4918_v15 = vpack.c.b16 %v967_v18, %v966_v13  ;;  %v969_v17 = vunpack.c.l.b16 %v909_v19  ;;  %v821_v32 = vrot.slane %v819_v44, 5  ;;  %v817_v5 = vrot.slane %v816_v29, 4  ;;  %v3822_v44 = vld [vmem:[%s5324_s2 + $0x2d8] sm:$0xff]  ;;  %v3821_v14 = vld [vmem:[%s5324_s2 + $0x2d0] sm:$0xff]  ;;  %v3796_v29 = vld [vmem:[%s5324_s2 + $0x208] sm:$0xff] }
  0xf9   : > { %v831_v53 = vrot.slane %v830_v12, 4  ;;  %v835_v37 = vrot.slane %v833_v10, 5  ;;  %v4926_v30 = vsel %vm359_vm8, %v1219_v42, %v1223_v39  ;;  %v3802_v42 = vld [vmem:[%s5324_s2 + $0x238] sm:$0xff]  ;;  %2189 = vmatpush.bf16.msra.mxu3 %v3825_v41  ;;  %v1643_v59 = vrot.slane %v4875_v48, 4  ;;  %v3797_v26 = vld [vmem:[%s5324_s2 + $0x210] sm:$0xff]  ;;  %v3812_v12 = vld [vmem:[%s5324_s2 + $0x288] sm:$0xff] }
  0xfa   : > { %v4921_v11 = vpack.c.b16 %v969_v17, %v968_v33  ;;  %v822_v47 = vsel %vm4648_vm11, %v817_v5, %v821_v32  ;;  %1964 = vmatpush.bf16.msra.mxu0 %v3802_v42  ;;  %1994 = vmatpush.bf16.msra.mxu1 %v3809_v9  ;;  %v1644_v61 = vrot.slane %v4893_v55, 4  ;;  %v3798_v13 = vld [vmem:[%s5324_s2 + $0x218] sm:$0xff]  ;;  %v3805_v27 = vld [vmem:[%s5324_s2 + $0x250] sm:$0xff]  ;;  %v1646_v10 = vrot.slane %v4901_v51, 4  ;;  %v3795_v18 = vld [vmem:[%s5324_s2 + $0x200] sm:$0xff] }
  0xfb   : > { %v836_v49 = vsel %vm4648_vm11, %v831_v53, %v835_v37  ;;  %v948_v22 = vunpack.c.l.b16 %v822_v47  ;;  %v3820_v33 = vld [vmem:[%s5324_s2 + $0x2c8] sm:$0xff]  ;;  %v3811_v17 = vld [vmem:[%s5324_s2 + $0x280] sm:$0xff]  ;;  %v1648_v53 = vrot.slane %v4918_v15, 4  ;;  %v3850_v47 = vld [vmem:[%s5324_s2 + $0x3b8] sm:$0xff] }
  0xfc   : > { %v949_v36 = vunpack.c.l.b16 %v836_v49  ;;  %v4997_v6 = vsel %vm359_vm8, %v1643_v59, %v1644_v61  ;;  %v5038_v19 = vsel %vm359_vm8, %v1644_v61, %v1646_v10  ;;  %v3819_v32 = vld [vmem:[%s5324_s2 + $0x2c0] sm:$0xff]  ;;  %v3858_v49 = vld [vmem:[%s5324_s2 + $0x3f8] sm:$0xff]  ;;  %v3849_v28 = vld [vmem:[%s5324_s2 + $0x3b0] sm:$0xff]  ;;  %v1650_v41 = vrot.slane %v4921_v11, 4 }
  0xfd   : > { %2190 = vmatpush.bf16.msra.mxu3 %v3824_v24  ;;  %v3803_v5 = vld [vmem:[%s5324_s2 + $0x240] sm:$0xff]  ;;  %v5061_v37 = vsel %vm359_vm8, %v1646_v10, %v1648_v53  ;;  %v3842_v42 = vld [vmem:[%s5324_s2 + $0x378] sm:$0xff]  ;;  %v3857_v45 = vld [vmem:[%s5324_s2 + $0x3f0] sm:$0xff] }
  0xfe   : > { %1356 = vmatmul.bf16.gmra.mxu2 %v4913_v46  ;;  %v4959_v38 = vpack.c.b16 %v949_v36, %v948_v22  ;;  %1965 = vmatpush.bf16.msra.mxu0 %v3801_v63  ;;  %v5089_v36 = vsel %vm359_vm8, %v1648_v53, %v1650_v41  ;;  %v3856_v24 = vld [vmem:[%s5324_s2 + $0x3e8] sm:$0xff]  ;;  %v3837_v41 = vld [vmem:[%s5324_s2 + $0x350] sm:$0xff] }
  0xff   : > { %1995 = vmatpush.bf16.msra.mxu1 %v3808_v0  ;;  %v3832_v0 = vld [vmem:[%s5324_s2 + $0x328] sm:$0xff] }
 0x100   : > { %v1227_v31 = vrot.slane %v4959_v38, 4 }
 0x101   : > { %2191 = vmatpush.bf16.msra.mxu3 %v3823_v57  ;;  %v3847_v57 = vld [vmem:[%s5324_s2 + $0x3a0] sm:$0xff] }
 0x102   : > { %1380 = vmatmul.bf16.gmra.mxu3 %v4926_v30  ;;  %v4964_v62 = vsel %vm359_vm8, %v1223_v39, %v1227_v31  ;;  %1966 = vmatpush.bf16.msra.mxu0 %v3800_v3  ;;  %v3804_v39 = vld [vmem:[%s5324_s2 + $0x248] sm:$0xff]  ;;  %v3833_v31 = vld [vmem:[%s5324_s2 + $0x330] sm:$0xff] }
 0x103   : > { %1996 = vmatpush.bf16.msra.mxu1 %v3807_v58 }
 0x105   : > { %2192 = vmatpush.bf16.msra.mxu3 %v3822_v44  ;;  %v3831_v44 = vld [vmem:[%s5324_s2 + $0x320] sm:$0xff] }
 0x106   : > { %1967 = vmatpush.bf16.msra.mxu0 %v3799_v7 }
 0x108   : > { %1552 = vmatmul.bf16.vlgmr.msrb.gmra.mxu0 %v4729_v20  ;;  %1164 = vmatmul.bf16.gmra.mxu1 %v4899_v4  ;;  %v3816_v20 = vld [vmem:[%s5324_s2 + $0x2a8] sm:$0xff] }
 0x109   : > { %2161 = vmatpush.bf16.msra.mxu2 %v3816_v20  ;;  %2193 = vmatpush.bf16.msra.mxu3 %v3821_v14  ;;  %v3841_v20 = vld [vmem:[%s5324_s2 + $0x370] sm:$0xff] }
 0x10a   : > { %1968 = vmatpush.bf16.msra.mxu0 %v3798_v13  ;;  %v3839_v13 = vld [vmem:[%s5324_s2 + $0x360] sm:$0xff] }
 0x10d   : > { %2162 = vmatpush.bf16.msra.mxu2 %v3815_v56  ;;  %2194 = vmatpush.bf16.msra.mxu3 %v3820_v33  ;;  %v3840_v56 = vld [vmem:[%s5324_s2 + $0x368] sm:$0xff] }
 0x10e   : > { %1760 = vmatmul.bf16.vlgmr.msrb.gmra.mxu2 %v4773_v35  ;;  %1969 = vmatpush.bf16.msra.mxu0 %v3797_v26  ;;  %v3830_v26 = vld [vmem:[%s5324_s2 + $0x318] sm:$0xff] }
 0x111   : > { %2163 = vmatpush.bf16.msra.mxu2 %v3814_v2  ;;  %2195 = vmatpush.bf16.msra.mxu3 %v3819_v32 }
 0x112   : > { %1385 = vmatmul.bf16.gmra.mxu3 %v4964_v62  ;;  %1970 = vmatpush.bf16.msra.mxu0 %v3796_v29  ;;  %v3853_v29 = vld [vmem:[%s5324_s2 + $0x3d0] sm:$0xff] }
 0x115   : > { %2164 = vmatpush.bf16.msra.mxu2 %v3813_v16  ;;  %v3854_v16 = vld [vmem:[%s5324_s2 + $0x3d8] sm:$0xff] }
 0x116   : > { %1971 = vmatpush.bf16.msra.mxu0 %v3795_v18 }
 0x118   : > { %1557 = vmatmul.bf16.gmra.mxu0 %v4761_v60  ;;  %1581 = vmatmul.bf16.vlgmr.msrb.gmra.mxu1 %v4875_v48  ;;  %v3806_v48 = vld [vmem:[%s5324_s2 + $0x258] sm:$0xff] }
 0x119   : > { %1997 = vmatpush.bf16.msra.mxu1 %v3806_v48  ;;  %2165 = vmatpush.bf16.msra.mxu2 %v3812_v12  ;;  %v5159_v12 = vld [vmem:[%s5325_s3] ss:$0 sm:$0xff] }
 0x11a   : > { %2371 = vmatpush.bf16.msrb.mxu0 %v3834_v21 }
 0x11d   : > { %1998 = vmatpush.bf16.msra.mxu1 %v3805_v27  ;;  %2166 = vmatpush.bf16.msra.mxu2 %v3811_v17  ;;  %v3838_v27 = vld [vmem:[%s5324_s2 + $0x358] sm:$0xff]  ;;  %v3829_v17 = vld [vmem:[%s5324_s2 + $0x310] sm:$0xff] }
 0x11e   : > { %1765 = vmatmul.bf16.gmra.mxu2 %v4858_v43  ;;  %2372 = vmatpush.bf16.msrb.mxu0 %v3833_v31  ;;  %v3852_v31 = vld [vmem:[%s5324_s2 + $0x3c8] sm:$0xff] }
 0x121   : > { %1999 = vmatpush.bf16.msra.mxu1 %v3804_v39  ;;  %2566 = vmatpush.bf16.msrb.mxu2 %v3850_v47 }
 0x122   : > { %1789 = vmatmul.bf16.vlgmr.msrb.gmra.mxu3 %v4997_v6  ;;  %2373 = vmatpush.bf16.msrb.mxu0 %v3832_v0 }
 0x123   : > { %2595 = vmatpush.bf16.msrb.mxu3 %v3858_v49 }
 0x125   : > { %2000 = vmatpush.bf16.msra.mxu1 %v3803_v5  ;;  %2567 = vmatpush.bf16.msrb.mxu2 %v3849_v28 }
 0x126   : > { %2374 = vmatpush.bf16.msrb.mxu0 %v3831_v44 }
 0x127   : > { %2596 = vmatpush.bf16.msrb.mxu3 %v3857_v45 }
 0x128   : > { %1562 = vmatmul.bf16.gmra.mxu0 %v4815_v25  ;;  %1586 = vmatmul.bf16.gmra.mxu1 %v4893_v55 }
 0x129   : > { %2400 = vmatpush.bf16.msrb.mxu1 %v3842_v42 }
 0x12a   : > { %2375 = vmatpush.bf16.msrb.mxu0 %v3830_v26 }
 0x12b   : > { %2597 = vmatpush.bf16.msrb.mxu3 %v3856_v24  ;;  %v3836_v24 = vld [vmem:[%s5324_s2 + $0x348] sm:$0xff] }
 0x12d   : > { %2401 = vmatpush.bf16.msrb.mxu1 %v3841_v20 }
 0x12e   : > { %1770 = vmatmul.bf16.gmra.mxu2 %v4926_v30  ;;  %2376 = vmatpush.bf16.msrb.mxu0 %v3829_v17 }
 0x131   : > { %2402 = vmatpush.bf16.msrb.mxu1 %v3840_v56 }
 0x132   : > { %1794 = vmatmul.bf16.gmra.mxu3 %v5038_v19 }
 0x135   : > { %2403 = vmatpush.bf16.msrb.mxu1 %v3839_v13 }
 0x138   : > { %1567 = vmatmul.bf16.gmra.mxu0 %v4899_v4  ;;  %1591 = vmatmul.bf16.gmra.mxu1 %v4901_v51 }
 0x139   : > { %2404 = vmatpush.bf16.msrb.mxu1 %v3838_v27 }
 0x13d   : > { %2405 = vmatpush.bf16.msrb.mxu1 %v3837_v41 }
 0x13e   : > { %1775 = vmatmul.bf16.gmra.mxu2 %v4964_v62 }
 0x141   : > { %2406 = vmatpush.bf16.msrb.mxu1 %v3836_v24 }
 0x142   : > { %1799 = vmatmul.bf16.gmra.mxu3 %v5061_v37 }
 0x145   : > { %v5070_v8 = vpop.f32.mrf.mxu0 }
 0x148   : > { %1972 = vmatmul.bf16.vlgmr.msra.gmra.mxu0 %v4662_v50  ;;  %1596 = vmatmul.bf16.gmra.mxu1 %v4918_v15 }
 0x14d   : > { %v1123_v50 = vpop.f32.mrf.mxu0 }
 0x14e   : > { %2167 = vmatmul.bf16.vlgmr.msra.gmra.mxu2 %v4627_v34  ;;  %v3848_v34 = vld [vmem:[%s5324_s2 + $0x3a8] sm:$0xff] }
 0x14f   : > { %2568 = vmatpush.bf16.msrb.mxu2 %v3848_v34  ;;  %v3827_v34 = vld [vmem:[%s5324_s2 + $0x300] sm:$0xff] }
 0x151   : > { %v1342_v22 = vpop.f32.mrf.mxu2 }
 0x152   : > { %1804 = vmatmul.bf16.gmra.mxu3 %v5089_v36 }
 0x153   : > { %2569 = vmatpush.bf16.msrb.mxu2 %v3847_v57  ;;  %v3835_v57 = vld [vmem:[%s5324_s2 + $0x340] sm:$0xff] }
 0x154   : > { %2407 = vmatpush.bf16.msrb.mxu1 %v3835_v57 }
 0x155   : > { %v5092_v63 = vpop.f32.mrf.mxu0  ;;  %v1150_v9 = vpop.f32.mrf.mxu1 }
 0x156   : > { %v1151_v10 = vadd.f32 %v1150_v9, %v5070_v8 }
 0x158   : > { %1977 = vmatmul.bf16.gmra.mxu0 %v4751_v23  ;;  %2001 = vmatmul.bf16.vlgmr.msra.gmra.mxu1 %v4773_v35  ;;  %v3855_v23 = vld [vmem:[%s5324_s2 + $0x3e0] sm:$0xff]  ;;  %v1170_v53 = vadd.f32 %v5159_v12, %v1151_v10 }
 0x159   : > { %v1344_v3 = vpop.f32.mrf.mxu2  ;;  %2598 = vmatpush.bf16.msrb.mxu3 %v3855_v23 }
 0x15d   : > { %v5120_v7 = vpop.f32.mrf.mxu0  ;;  %v1152_v58 = vpop.f32.mrf.mxu1  ;;  %2599 = vmatpush.bf16.msrb.mxu3 %v3854_v16 }
 0x15e   : > { %2172 = vmatmul.bf16.gmra.mxu2 %v4717_v40  ;;  %v3846_v40 = vld [vmem:[%s5324_s2 + $0x398] sm:$0xff]  ;;  %v1153_v18 = vadd.f32 %v1152_v58, %v1123_v50  ;;  %v3828_v50 = vld [vmem:[%s5324_s2 + $0x308] sm:$0xff] }
 0x15f   : > { %2570 = vmatpush.bf16.msrb.mxu2 %v3846_v40  ;;  %2377 = vmatpush.bf16.msrb.mxu0 %v3828_v50 }
 0x160   : > { %v1171_v47 = vadd.f32 %v5159_v12, %v1153_v18 }
 0x161   : > { %v5123_v59 = vpop.f32.mrf.mxu2  ;;  %2600 = vmatpush.bf16.msrb.mxu3 %v3853_v29 }
 0x162   : > { %2196 = vmatmul.bf16.vlgmr.msra.gmra.mxu3 %v4761_v60 }
 0x163   : > { %2378 = vmatpush.bf16.msrb.mxu0 %v3827_v34 }
 0x165   : > { %v5126_v61 = vpop.f32.mrf.mxu0  ;;  %v1155_v2 = vpop.f32.mrf.mxu1  ;;  %2601 = vmatpush.bf16.msrb.mxu3 %v3852_v31 }
 0x166   : > { %v1371_v48 = vpop.f32.mrf.mxu3  ;;  %v1156_v0 = vadd.f32 %v1155_v2, %v5092_v63 }
 0x167   : > { %v1372_v39 = vadd.f32 %v1371_v48, %v1342_v22  ;;  %v3844_v22 = vld [vmem:[%s5324_s2 + $0x388] sm:$0xff] }
 0x168   : > { %1982 = vmatmul.bf16.gmra.mxu0 %v4828_v1  ;;  %2006 = vmatmul.bf16.gmra.mxu1 %v4858_v43  ;;  %v3845_v1 = vld [vmem:[%s5324_s2 + $0x390] sm:$0xff]  ;;  %v1172_v63 = vadd.f32 %v5159_v12, %v1156_v0 }
 0x169   : > { %v5142_v14 = vpop.f32.mrf.mxu2  ;;  %2571 = vmatpush.bf16.msrb.mxu2 %v3845_v1  ;;  %v1391_v21 = vadd.f32 %v1372_v39, %v1170_v53 }
 0x16d   : > { %v5163_v33 = vpop.f32.mrf.mxu0  ;;  %v1157_v32 = vpop.f32.mrf.mxu1  ;;  %2572 = vmatpush.bf16.msrb.mxu2 %v3844_v22 }
 0x16e   : > { %2177 = vmatmul.bf16.gmra.mxu2 %v4780_v54  ;;  %v1373_v5 = vpop.f32.mrf.mxu3  ;;  %v1158_v56 = vadd.f32 %v1157_v32, %v5120_v7 }
 0x16f   : > { %v1374_v49 = vadd.f32 %v1373_v5, %v1344_v3  ;;  %v3851_v3 = vld [vmem:[%s5324_s2 + $0x3c0] sm:$0xff] }
 0x170   : > { %2602 = vmatpush.bf16.msrb.mxu3 %v3851_v3  ;;  %v1173_v7 = vadd.f32 %v5159_v12, %v1158_v56 }
 0x171   : > { %v1352_v8 = vpop.f32.mrf.mxu2  ;;  %v1392_v42 = vadd.f32 %v1374_v49, %v1171_v47 }
 0x172   : > { %2201 = vmatmul.bf16.gmra.mxu3 %v4815_v25 }
 0x173   : > { %v3862_v28 = vpack.c.bf16 %v1392_v42, %v1391_v21 }
 0x175   : > { %v5172_v45 = vpop.f32.mrf.mxu0  ;;  %3863 = vst [vmem:[%s5174_s15] sm:$0xff] %v3862_v28   ;;  %v1160_v54 = vpop.f32.mrf.mxu1 }
 0x176   : > { %v1376_v9 = vpop.f32.mrf.mxu3  ;;  %v1161_v29 = vadd.f32 %v1160_v54, %v5126_v61 }
 0x177   : > { %v1377_v58 = vadd.f32 %v1376_v9, %v5123_v59 }
 0x178   : > { %1987 = vmatmul.bf16.gmra.mxu0 %v4913_v46  ;;  %2011 = vmatmul.bf16.gmra.mxu1 %v4926_v30  ;;  %v3843_v46 = vld [vmem:[%s5324_s2 + $0x380] sm:$0xff]  ;;  %v1174_v32 = vadd.f32 %v5159_v12, %v1161_v29 }
 0x179   : > { %v1354_v20 = vpop.f32.mrf.mxu2  ;;  %2573 = vmatpush.bf16.msrb.mxu2 %v3843_v46  ;;  %v1393_v48 = vadd.f32 %v1377_v58, %v1172_v63 }
 0x17d   : > { %v1138_v23 = vpop.f32.mrf.mxu0  ;;  %v1162_v44 = vpop.f32.mrf.mxu1 }
 0x17e   : > { %2182 = vmatmul.bf16.gmra.mxu2 %v4833_v52  ;;  %v1378_v13 = vpop.f32.mrf.mxu3 }
 0x17f   : > { %v1379_v2 = vadd.f32 %v1378_v13, %v5142_v14  ;;  %v1163_v14 = vadd.f32 %v1162_v44, %v5163_v33 }
 0x181   : > { %v1357_v40 = vpop.f32.mrf.mxu2  ;;  %v1394_v16 = vadd.f32 %v1379_v2, %v1173_v7  ;;  %v1175_v5 = vadd.f32 %v5159_v12, %v1163_v14 }
 0x182   : > { %2206 = vmatmul.bf16.gmra.mxu3 %v4899_v4 }
 0x183   : > { %v3867_v26 = vpack.c.bf16 %v1394_v16, %v1393_v48 }
 0x185   : > { %v1553_v59 = vpop.f32.mrf.mxu0  ;;  %3939 = vst [vmem:[%s5174_s15 + $0x8] sm:$0xff] %v3867_v26   ;;  %v1165_v27 = vpop.f32.mrf.mxu1 }
 0x186   : > { %v1381_v52 = vpop.f32.mrf.mxu3 }
 0x187   : > { %v1382_v18 = vadd.f32 %v1381_v52, %v1352_v8  ;;  %v1166_v8 = vadd.f32 %v1165_v27, %v5172_v45 }
 0x188   : > { %2379 = vmatmul.bf16.vlgmr.msrb.gmra.mxu0 %v4773_v35  ;;  %2016 = vmatmul.bf16.gmra.mxu1 %v4964_v62 }
 0x189   : > { %v1359_v1 = vpop.f32.mrf.mxu2  ;;  %v1395_v47 = vadd.f32 %v1382_v18, %v1174_v32  ;;  %v1176_v9 = vadd.f32 %v5159_v12, %v1166_v8 }
 0x18d   : > { %v1555_v10 = vpop.f32.mrf.mxu0  ;;  %v1167_v17 = vpop.f32.mrf.mxu1 }
 0x18e   : > { %2574 = vmatmul.bf16.vlgmr.msrb.gmra.mxu2 %v4761_v60  ;;  %v1383_v39 = vpop.f32.mrf.mxu3  ;;  %v1168_v28 = vadd.f32 %v1167_v17, %v1138_v23 }
 0x18f   : > { %v1384_v53 = vadd.f32 %v1383_v39, %v1354_v20 }
 0x190   : > { %v1177_v31 = vadd.f32 %v5159_v12, %v1168_v28 }
 0x191   : > { %v1761_v35 = vpop.f32.mrf.mxu2  ;;  %v1396_v49 = vadd.f32 %v1384_v53, %v1175_v5 }
 0x192   : > { %2211 = vmatmul.bf16.gmra.mxu3 %v4959_v38 }
 0x193   : > { %v3872_v21 = vpack.c.bf16 %v1396_v49, %v1395_v47 }
 0x195   : > { %v1558_v61 = vpop.f32.mrf.mxu0  ;;  %3940 = vst [vmem:[%s5174_s15 + $0x10] sm:$0xff] %v3872_v21   ;;  %v1582_v33 = vpop.f32.mrf.mxu1 }
 0x196   : > { %v1386_v42 = vpop.f32.mrf.mxu3  ;;  %v1583_v0 = vadd.f32 %v1582_v33, %v1553_v59 }
 0x197   : > { %v1387_v50 = vadd.f32 %v1386_v42, %v1357_v40 }
 0x198   : > { %2384 = vmatmul.bf16.gmra.mxu0 %v4858_v43  ;;  %2408 = vmatmul.bf16.vlgmr.msrb.gmra.mxu1 %v4997_v6 }
 0x199   : > { %v1763_v60 = vpop.f32.mrf.mxu2  ;;  %v1397_v43 = vadd.f32 %v1387_v50, %v1176_v9 }
 0x19d   : > { %v1560_v54 = vpop.f32.mrf.mxu0  ;;  %v1584_v41 = vpop.f32.mrf.mxu1 }
 0x19e   : > { %2579 = vmatmul.bf16.gmra.mxu2 %v4815_v25  ;;  %v1388_v22 = vpop.f32.mrf.mxu3  ;;  %v1585_v56 = vadd.f32 %v1584_v41, %v1555_v10 }
 0x19f   : > { %v1389_v20 = vadd.f32 %v1388_v22, %v1359_v1 }
 0x1a0   : > { %v1603_v13 = vadd.f32 %v5159_v12, %v1585_v56 }
 0x1a1   : > { %v1766_v34 = vpop.f32.mrf.mxu2  ;;  %v1398_v24 = vadd.f32 %v1389_v20, %v1177_v31 }
 0x1a2   : > { %2603 = vmatmul.bf16.vlgmr.msrb.gmra.mxu3 %v4893_v55  ;;  %v1602_v55 = vadd.f32 %v5159_v12, %v1583_v0 }
 0x1a3   : > { %v3877_v6 = vpack.c.bf16 %v1398_v24, %v1397_v43 }
 0x1a5   : > { %v1563_v45 = vpop.f32.mrf.mxu0  ;;  %3941 = vst [vmem:[%s5174_s15 + $0x18] sm:$0xff] %v3877_v6   ;;  %v1587_v3 = vpop.f32.mrf.mxu1 }
 0x1a6   : > { %v1790_v46 = vpop.f32.mrf.mxu3  ;;  %v1588_v26 = vadd.f32 %v1587_v3, %v1558_v61 }
 0x1a7   : > { %v1791_v23 = vadd.f32 %v1790_v46, %v1761_v35 }
 0x1a8   : > { %2389 = vmatmul.bf16.gmra.mxu0 %v4926_v30  ;;  %2413 = vmatmul.bf16.gmra.mxu1 %v5038_v19 }
 0x1a9   : > { %v1768_v25 = vpop.f32.mrf.mxu2  ;;  %v1810_v2 = vadd.f32 %v1791_v23, %v1602_v55 }
 0x1ad   : > { %v1565_v57 = vpop.f32.mrf.mxu0  ;;  %v1589_v58 = vpop.f32.mrf.mxu1 }
 0x1ae   : > { %2584 = vmatmul.bf16.gmra.mxu2 %v4899_v4  ;;  %v1792_v44 = vpop.f32.mrf.mxu3  ;;  %v1590_v59 = vadd.f32 %v1589_v58, %v1560_v54 }
 0x1af   : > { %v1793_v63 = vadd.f32 %v1792_v44, %v1763_v60 }
 0x1b0   : > { %v1605_v14 = vadd.f32 %v5159_v12, %v1590_v59 }
 0x1b1   : > { %v1771_v7 = vpop.f32.mrf.mxu2  ;;  %v1811_v30 = vadd.f32 %v1793_v63, %v1603_v13 }
 0x1b2   : > { %2608 = vmatmul.bf16.gmra.mxu3 %v4901_v51  ;;  %v1604_v51 = vadd.f32 %v5159_v12, %v1588_v26 }
 0x1b3   : > { %v3882_v40 = vpack.c.bf16 %v1811_v30, %v1810_v2 }
 0x1b5   : > { %v1568_v19 = vpop.f32.mrf.mxu0  ;;  %3942 = vst [vmem:[%s5174_s15 + $0x20] sm:$0xff] %v3882_v40   ;;  %v1592_v48 = vpop.f32.mrf.mxu1 }
 0x1b6   : > { %v1795_v16 = vpop.f32.mrf.mxu3  ;;  %v1593_v53 = vadd.f32 %v1592_v48, %v1563_v45 }
 0x1b7   : > { %v1796_v52 = vadd.f32 %v1795_v16, %v1766_v34 }
 0x1b8   : > { %2394 = vmatmul.bf16.gmra.mxu0 %v4964_v62  ;;  %2418 = vmatmul.bf16.gmra.mxu1 %v5061_v37  ;;  %v1606_v33 = vadd.f32 %v5159_v12, %v1593_v53 }
 0x1b9   : > { %v1773_v4 = vpop.f32.mrf.mxu2  ;;  %v1812_v17 = vadd.f32 %v1796_v52, %v1604_v51 }
 0x1bd   : > { %v1570_v27 = vpop.f32.mrf.mxu0  ;;  %v1594_v1 = vpop.f32.mrf.mxu1 }
 0x1be   : > { %2589 = vmatmul.bf16.gmra.mxu2 %v4959_v38  ;;  %v1797_v29 = vpop.f32.mrf.mxu3  ;;  %v1595_v35 = vadd.f32 %v1594_v1, %v1565_v57 }
 0x1bf   : > { %v1798_v10 = vadd.f32 %v1797_v29, %v1768_v25 }
 0x1c0   : > { %v1607_v42 = vadd.f32 %v5159_v12, %v1595_v35 }
 0x1c1   : > { %v1776_v18 = vpop.f32.mrf.mxu2  ;;  %v1813_v62 = vadd.f32 %v1798_v10, %v1605_v14 }
 0x1c2   : > { %2613 = vmatmul.bf16.gmra.mxu3 %v4918_v15 }
 0x1c3   : > { %v3887_v39 = vpack.c.bf16 %v1813_v62, %v1812_v17 }
 0x1c5   : > { %v1973_v37 = vpop.f32.mrf.mxu0  ;;  %3943 = vst [vmem:[%s5174_s15 + $0x28] sm:$0xff] %v3887_v39   ;;  %v1597_v32 = vpop.f32.mrf.mxu1 }
 0x1c6   : > { %v1800_v5 = vpop.f32.mrf.mxu3  ;;  %v1598_v9 = vadd.f32 %v1597_v32, %v1568_v19 }
 0x1c7   : > { %v1801_v47 = vadd.f32 %v1800_v5, %v1771_v7 }
 0x1c8   : > { %2423 = vmatmul.bf16.gmra.mxu1 %v5089_v36  ;;  %v1608_v24 = vadd.f32 %v5159_v12, %v1598_v9 }
 0x1c9   : > { %v1778_v38 = vpop.f32.mrf.mxu2  ;;  %v1814_v8 = vadd.f32 %v1801_v47, %v1606_v33 }
 0x1cd   : > { %v1599_v49 = vpop.f32.mrf.mxu1  ;;  %v1975_v61 = vpop.f32.mrf.mxu0 }
 0x1ce   : > { %v1802_v21 = vpop.f32.mrf.mxu3  ;;  %v1600_v31 = vadd.f32 %v1599_v49, %v1570_v27 }
 0x1cf   : > { %v1803_v60 = vadd.f32 %v1802_v21, %v1773_v4 }
 0x1d0   : > { %v1609_v6 = vadd.f32 %v5159_v12, %v1600_v31 }
 0x1d1   : > { %v2168_v15 = vpop.f32.mrf.mxu2  ;;  %v1815_v28 = vadd.f32 %v1803_v60, %v1607_v42 }
 0x1d2   : > { %2618 = vmatmul.bf16.gmra.mxu3 %v4921_v11 }
 0x1d3   : > { %v3892_v54 = vpack.c.bf16 %v1815_v28, %v1814_v8 }
 0x1d5   : > { %3944 = vst [vmem:[%s5174_s15 + $0x30] sm:$0xff] %v3892_v54   ;;  %v2002_v36 = vpop.f32.mrf.mxu1  ;;  %v1978_v41 = vpop.f32.mrf.mxu0 }
 0x1d6   : > { %v1805_v50 = vpop.f32.mrf.mxu3  ;;  %v2003_v58 = vadd.f32 %v2002_v36, %v1973_v37 }
 0x1d7   : > { %v1806_v20 = vadd.f32 %v1805_v50, %v1776_v18 }
 0x1d8   : > { %v2022_v2 = vadd.f32 %v5159_v12, %v2003_v58 }
 0x1d9   : > { %v2170_v22 = vpop.f32.mrf.mxu2  ;;  %v1816_v46 = vadd.f32 %v1806_v20, %v1608_v24 }
 0x1dd   : > { %v2004_v34 = vpop.f32.mrf.mxu1  ;;  %v1980_v11 = vpop.f32.mrf.mxu0 }
 0x1de   : > { %v1807_v43 = vpop.f32.mrf.mxu3  ;;  %v2005_v44 = vadd.f32 %v2004_v34, %v1975_v61 }
 0x1df   : > { %v1808_v45 = vadd.f32 %v1807_v43, %v1778_v38 }
 0x1e0   : > { %v2023_v30 = vadd.f32 %v5159_v12, %v2005_v44 }
 0x1e1   : > { %v2173_v3 = vpop.f32.mrf.mxu2  ;;  %v1817_v25 = vadd.f32 %v1808_v45, %v1609_v6 }
 0x1e3   : > { %v3897_v0 = vpack.c.bf16 %v1817_v25, %v1816_v46 }
 0x1e5   : > { %3945 = vst [vmem:[%s5174_s15 + $0x38] sm:$0xff] %v3897_v0   ;;  %v2007_v56 = vpop.f32.mrf.mxu1  ;;  %v1983_v55 = vpop.f32.mrf.mxu0 }
 0x1e6   : > { %v2197_v57 = vpop.f32.mrf.mxu3  ;;  %v2008_v1 = vadd.f32 %v2007_v56, %v1978_v41 }
 0x1e7   : > { %v2198_v13 = vadd.f32 %v2197_v57, %v2168_v15 }
 0x1e8   : > { %v2024_v18 = vadd.f32 %v5159_v12, %v2008_v1 }
 0x1e9   : > { %v2175_v23 = vpop.f32.mrf.mxu2  ;;  %v2217_v48 = vadd.f32 %v2198_v13, %v2022_v2 }
 0x1ed   : > { %v2009_v63 = vpop.f32.mrf.mxu1  ;;  %v1985_v27 = vpop.f32.mrf.mxu0 }
 0x1ee   : > { %v2199_v7 = vpop.f32.mrf.mxu3  ;;  %v2010_v29 = vadd.f32 %v2009_v63, %v1980_v11 }
 0x1ef   : > { %v2200_v40 = vadd.f32 %v2199_v7, %v2170_v22 }
 0x1f0   : > { %v2025_v17 = vadd.f32 %v5159_v12, %v2010_v29 }
 0x1f1   : > { %v2178_v19 = vpop.f32.mrf.mxu2  ;;  %v2218_v16 = vadd.f32 %v2200_v40, %v2023_v30 }
 0x1f3   : > { %v3902_v4 = vpack.c.bf16 %v2218_v16, %v2217_v48 }
 0x1f5   : > { %3946 = vst [vmem:[%s5174_s15 + $0x40] sm:$0xff] %v3902_v4   ;;  %v2012_v26 = vpop.f32.mrf.mxu1  ;;  %v1988_v39 = vpop.f32.mrf.mxu0 }
 0x1f6   : > { %v2202_v59 = vpop.f32.mrf.mxu3  ;;  %v2013_v49 = vadd.f32 %v2012_v26, %v1983_v55 }
 0x1f7   : > { %v2203_v51 = vadd.f32 %v2202_v59, %v2173_v3 }
 0x1f8   : > { %v2026_v15 = vadd.f32 %v5159_v12, %v2013_v49 }
 0x1f9   : > { %v2180_v52 = vpop.f32.mrf.mxu2  ;;  %v2219_v37 = vadd.f32 %v2203_v51, %v2024_v18 }
 0x1fd   : > { %v2014_v14 = vpop.f32.mrf.mxu1  ;;  %v1990_v47 = vpop.f32.mrf.mxu0 }
 0x1fe   : > { %v2204_v10 = vpop.f32.mrf.mxu3  ;;  %v2015_v21 = vadd.f32 %v2014_v14, %v1985_v27 }
 0x1ff   : > { %v2205_v62 = vadd.f32 %v2204_v10, %v2175_v23 }
 0x200   : > { %v2027_v8 = vadd.f32 %v5159_v12, %v2015_v21 }
 0x201   : > { %v2220_v32 = vadd.f32 %v2205_v62, %v2025_v17  ;;  %v2183_v38 = vpop.f32.mrf.mxu2 }
 0x203   : > { %v3907_v5 = vpack.c.bf16 %v2220_v32, %v2219_v37 }
 0x205   : > { %3947 = vst [vmem:[%s5174_s15 + $0x48] sm:$0xff] %v3907_v5   ;;  %v2017_v53 = vpop.f32.mrf.mxu1  ;;  %v2380_v41 = vpop.f32.mrf.mxu0 }
 0x206   : > { %v2207_v35 = vpop.f32.mrf.mxu3  ;;  %v2018_v20 = vadd.f32 %v2017_v53, %v1988_v39 }
 0x207   : > { %v2208_v61 = vadd.f32 %v2207_v35, %v2178_v19 }
 0x208   : > { %v2028_v3 = vadd.f32 %v5159_v12, %v2018_v20 }
 0x209   : > { %v2185_v60 = vpop.f32.mrf.mxu2  ;;  %v2221_v54 = vadd.f32 %v2208_v61, %v2026_v15 }
 0x20d   : > { %v2019_v33 = vpop.f32.mrf.mxu1  ;;  %v2382_v6 = vpop.f32.mrf.mxu0 }
 0x20e   : > { %v2209_v42 = vpop.f32.mrf.mxu3  ;;  %v2020_v34 = vadd.f32 %v2019_v33, %v1990_v47 }
 0x20f   : > { %v2210_v28 = vadd.f32 %v2209_v42, %v2180_v52 }
 0x210   : > { %v2029_v46 = vadd.f32 %v5159_v12, %v2020_v34 }
 0x211   : > { %v2222_v36 = vadd.f32 %v2210_v28, %v2027_v8  ;;  %v2575_v31 = vpop.f32.mrf.mxu2 }
 0x213   : > { %v3912_v50 = vpack.c.bf16 %v2222_v36, %v2221_v54 }
 0x215   : > { %3948 = vst [vmem:[%s5174_s15 + $0x50] sm:$0xff] %v3912_v50   ;;  %v2409_v22 = vpop.f32.mrf.mxu1  ;;  %v2385_v44 = vpop.f32.mrf.mxu0 }
 0x216   : > { %v2212_v9 = vpop.f32.mrf.mxu3  ;;  %v2410_v55 = vadd.f32 %v2409_v22, %v2380_v41 }
 0x217   : > { %v2213_v43 = vadd.f32 %v2212_v9, %v2183_v38 }
 0x218   : > { %v2429_v30 = vadd.f32 %v5159_v12, %v2410_v55  ;;  %v2697_v55 = vld [vmem:[%s5174_s15 + $0x28] sm:$0xff] (%p4162_p5)  }
 0x219   : > { %v2223_v11 = vadd.f32 %v2213_v43, %v2028_v3  ;;  %v2577_v56 = vpop.f32.mrf.mxu2  ;;  %2698 = vst [vmem:[%s2660_s26 + $0x48] sm:$0xff] (%p4162_p5), %v2697_v55  }
 0x21d   : > { %v2411_v24 = vpop.f32.mrf.mxu1  ;;  %v2387_v26 = vpop.f32.mrf.mxu0 }
 0x21e   : > { %v2214_v45 = vpop.f32.mrf.mxu3  ;;  %v2412_v13 = vadd.f32 %v2411_v24, %v2382_v6 }
 0x21f   : > { %v2215_v25 = vadd.f32 %v2214_v45, %v2185_v60 }
 0x220   : > { %v2430_v40 = vadd.f32 %v5159_v12, %v2412_v13  ;;  %v2701_v13 = vld [vmem:[%s5174_s15 + $0x30] sm:$0xff] (%p4162_p5)  }
 0x221   : > { %v2224_v0 = vadd.f32 %v2215_v25, %v2029_v46  ;;  %v2580_v63 = vpop.f32.mrf.mxu2  ;;  %2702 = vst [vmem:[%s2660_s26 + $0x50] sm:$0xff] (%p4162_p5), %v2701_v13  }
 0x223   : > { %v3917_v57 = vpack.c.bf16 %v2224_v0, %v2223_v11 }
 0x225   : > { %3949 = vst [vmem:[%s5174_s15 + $0x58] sm:$0xff] %v3917_v57   ;;  %v2414_v58 = vpop.f32.mrf.mxu1  ;;  %v2390_v14 = vpop.f32.mrf.mxu0  ;;  %v2681_v57 = vld [vmem:[%s5174_s15 + $0x8] sm:$0xff] (%p4162_p5)  }
 0x226   : > { %v2604_v23 = vpop.f32.mrf.mxu3  ;;  %v2415_v29 = vadd.f32 %v2414_v58, %v2385_v44  ;;  %v2689_v58 = vld [vmem:[%s5174_s15 + $0x18] sm:$0xff] (%p4162_p5)   ;;  %2682 = vst [vmem:[%s2660_s26 + $0x8] sm:$0xff] (%p4162_p5), %v2681_v57   ;;  %v2693_v44 = vld [vmem:[%s5174_s15 + $0x20] sm:$0xff] (%p4162_p5)  }
 0x227   : > { %v2605_v7 = vadd.f32 %v2604_v23, %v2575_v31  ;;  %v2685_v23 = vld [vmem:[%s5174_s15 + $0x10] sm:$0xff] (%p4162_p5)   ;;  %2690 = vst [vmem:[%s2660_s26 + $0x18] sm:$0xff] (%p4162_p5), %v2689_v58  }
 0x228   : > { %v2431_v17 = vadd.f32 %v5159_v12, %v2415_v29  ;;  %2686 = vst [vmem:[%s2660_s26 + $0x10] sm:$0xff] (%p4162_p5), %v2685_v23  }
 0x229   : > { %v2624_v16 = vadd.f32 %v2605_v7, %v2429_v30  ;;  %v2582_v27 = vpop.f32.mrf.mxu2  ;;  %2694 = vst [vmem:[%s2660_s26 + $0x40] sm:$0xff] (%p4162_p5), %v2693_v44   ;;  %v2709_v7 = vld [vmem:[%s5174_s15 + $0x40] sm:$0xff] (%p4162_p5)   ;;  %v2717_v30 = vld [vmem:[%s5174_s15 + $0x50] sm:$0xff] (%p4162_p5)  }
 0x22a   : > { %2710 = vst [vmem:[%s2660_s26 + $0x80] sm:$0xff] (%p4162_p5), %v2709_v7  }
 0x22b   : > { %2718 = vst [vmem:[%s2660_s26 + $0x90] sm:$0xff] (%p4162_p5), %v2717_v30  }
 0x22d   : > { %v2416_v48 = vpop.f32.mrf.mxu1  ;;  %v2392_v35 = vpop.f32.mrf.mxu0 }
 0x22e   : > { %v2606_v2 = vpop.f32.mrf.mxu3  ;;  %v2417_v51 = vadd.f32 %v2416_v48, %v2387_v26 }
 0x22f   : > { %v2607_v19 = vadd.f32 %v2606_v2, %v2577_v56  ;;  %v2713_v2 = vld [vmem:[%s5174_s15 + $0x48] sm:$0xff] (%p4162_p5)  }
 0x230   : > { %v2432_v62 = vadd.f32 %v5159_v12, %v2417_v51  ;;  %2714 = vst [vmem:[%s2660_s26 + $0x88] sm:$0xff] (%p4162_p5), %v2713_v2  }
 0x231   : > { %v2625_v4 = vadd.f32 %v2607_v19, %v2430_v40  ;;  %v2585_v37 = vpop.f32.mrf.mxu2  ;;  %v2721_v40 = vld [vmem:[%s5174_s15 + $0x58] sm:$0xff] (%p4162_p5)  }
 0x232   : > { %2722 = vst [vmem:[%s2660_s26 + $0x98] sm:$0xff] (%p4162_p5), %v2721_v40  }
 0x233   : > { %v3922_v59 = vpack.c.bf16 %v2625_v4, %v2624_v16 }
 0x235   : > { %3950 = vst [vmem:[%s5174_s15 + $0x60] sm:$0xff] %v3922_v59   ;;  %v2419_v1 = vpop.f32.mrf.mxu1  ;;  %v2395_v54 = vpop.f32.mrf.mxu0 }
 0x236   : > { %v2609_v52 = vpop.f32.mrf.mxu3  ;;  %v2420_v21 = vadd.f32 %v2419_v1, %v2390_v14 }
 0x237   : > { %v2610_v10 = vadd.f32 %v2609_v52, %v2580_v63  ;;  %v2705_v63 = vld [vmem:[%s5174_s15 + $0x38] sm:$0xff] (%p4162_p5)  }
 0x238   : > { %v2433_v15 = vadd.f32 %v5159_v12, %v2420_v21  ;;  %2706 = vst [vmem:[%s2660_s26 + $0x58] sm:$0xff] (%p4162_p5), %v2705_v63  }
 0x239   : > { %v2626_v32 = vadd.f32 %v2610_v10, %v2431_v17  ;;  %v2587_v49 = vpop.f32.mrf.mxu2 }
 0x23c   : > { %v2725_v19 = vld [vmem:[%s5174_s15 + $0x60] sm:$0xff] (%p4162_p5)  }
 0x23d   : > { %v2421_v53 = vpop.f32.mrf.mxu1  ;;  %v2397_v20 = vpop.f32.mrf.mxu0  ;;  %2726 = vst [vmem:[%s2660_s26 + $0xc0] sm:$0xff] (%p4162_p5), %v2725_v19  }
 0x23e   : > { %v2611_v18 = vpop.f32.mrf.mxu3  ;;  %v2422_v61 = vadd.f32 %v2421_v53, %v2392_v35 }
 0x23f   : > { %v2612_v39 = vadd.f32 %v2611_v18, %v2582_v27 }
 0x240   : > { %v2434_v8 = vadd.f32 %v5159_v12, %v2422_v61 }
 0x241   : > { %v2627_v5 = vadd.f32 %v2612_v39, %v2432_v62  ;;  %v2590_v22 = vpop.f32.mrf.mxu2 }
 0x243   : > { %v3927_v38 = vpack.c.bf16 %v2627_v5, %v2626_v32 }
 0x245   : > { %3951 = vst [vmem:[%s5174_s15 + $0x68] sm:$0xff] %v3927_v38   ;;  %v2424_v42 = vpop.f32.mrf.mxu1 }
 0x246   : > { %v2614_v47 = vpop.f32.mrf.mxu3  ;;  %v2425_v34 = vadd.f32 %v2424_v42, %v2395_v54 }
 0x247   : > { %v2615_v33 = vadd.f32 %v2614_v47, %v2585_v37 }
 0x248   : > { %v2435_v3 = vadd.f32 %v5159_v12, %v2425_v34 }
 0x249   : > { %v2628_v36 = vadd.f32 %v2615_v33, %v2433_v15  ;;  %v2592_v6 = vpop.f32.mrf.mxu2 }
 0x24c   : > { %v2729_v48 = vld [vmem:[%s5174_s15 + $0x68] sm:$0xff] (%p4162_p5)  }
 0x24d   : > { %v2426_v31 = vpop.f32.mrf.mxu1  ;;  %2730 = vst [vmem:[%s2660_s26 + $0xc8] sm:$0xff] (%p4162_p5), %v2729_v48  }
 0x24e   : > { %v2616_v60 = vpop.f32.mrf.mxu3  ;;  %v2427_v43 = vadd.f32 %v2426_v31, %v2397_v20 }
 0x24f   : > { %v2617_v28 = vadd.f32 %v2616_v60, %v2587_v49 }
 0x250   : > { %v2436_v46 = vadd.f32 %v5159_v12, %v2427_v43  ;;  %v2677_v12 = vld [vmem:[%s5174_s15] sm:$0xff] (%p4162_p5)  }
 0x251   : > { %v2629_v50 = vadd.f32 %v2617_v28, %v2434_v8  ;;  %2678 = vst [vmem:[%s2660_s26] sm:$0xff] (%p4162_p5), %v2677_v12  }
 0x253   : > { %v3932_v41 = vpack.c.bf16 %v2629_v50, %v2628_v36 }
 0x255   : > { %3952 = vst [vmem:[%s5174_s15 + $0x70] sm:$0xff] %v3932_v41  }
 0x256   : > { %v2619_v9 = vpop.f32.mrf.mxu3 }
 0x257   : > { %v2620_v24 = vadd.f32 %v2619_v9, %v2590_v22 }
 0x259   : > { %v2630_v11 = vadd.f32 %v2620_v24, %v2435_v3 }
 0x25c   : > { %v2733_v16 = vld [vmem:[%s5174_s15 + $0x70] sm:$0xff] (%p4162_p5)  }
 0x25d   : > { %2734 = vst [vmem:[%s2660_s26 + $0xd0] sm:$0xff] (%p4162_p5), %v2733_v16  }
 0x25e   : > { %v2621_v45 = vpop.f32.mrf.mxu3 }
 0x25f   : > { %v2622_v25 = vadd.f32 %v2621_v45, %v2592_v6 }
 0x261   : > { %v2631_v0 = vadd.f32 %v2622_v25, %v2436_v46  ;;  %2655 = sbr.rel (!%p4162_p5) target bundleno = 622 (0x26e), region = 40 }
 0x263   : > { %v3937_v56 = vpack.c.bf16 %v2631_v0, %v2630_v11 }
 0x265   : > { %3953 = vst [vmem:[%s5174_s15 + $0x78] sm:$0xff] %v3937_v56  }
 0x26c   : > { %v2737_v4 = vld [vmem:[%s5174_s15 + $0x78] sm:$0xff]  }
 0x26d   : > { %2738 = vst [vmem:[%s2660_s26 + $0xd8] sm:$0xff] %v2737_v4  }
 0x26e PF: > { %s14_s21 = sadd.s32 1, %s4088_s21   ;;  %s5354_s15 = smov %s4068_s16 }
 0x26f   : > { %p11_p12 = scmp.ge.s32.totalorder %s14_s21, 6   ;;  %s5355_s16 = smov %s4173_s30 }
 0x270   : > { %s5356_s17 = smov %s4080_s19  ;;  %s5357_s18 = smov %s4084_s20 }
 0x271   : > { %s5358_s19 = smov %s5361_s22  ;;  %s5359_s20 = smov %s5365_s23 }
 0x272   :  { %13 = sbr.rel (!%p11_p12) target bundleno = 4 (0x4), region = 122 }

</bundles_post_ra>
